<compile_context>
chip_gen: v7x
topology: tpu7x:2x2x1
jax: 0.10.0
libtpu: 0.0.40
codegen_flags: <defaults>
</compile_context>

<pallas_src>
import jax
import jax.numpy as jnp
from jax import lax
from jax.experimental import pallas as pl
from jax.experimental.pallas import tpu as pltpu


def lstm_fc_kernel(x_ref, wih_ref, whh_ref, b_ref, wfc_ref, bfc_ref, out_ref, gx_ref):
    """x_ref:   (T, Bp, E)   embedded tokens, time-major, batch padded to 8.
    wih_ref: (4, E, H)    per-gate input weights (gate order i, f, g, o).
    whh_ref: (4, H, H)    per-gate recurrent weights.
    b_ref:   (4, 1, H)    per-gate combined bias (b_ih + b_hh).
    wfc_ref: (H, Op)      FC weight, output padded to 128 lanes.
    bfc_ref: (1, Op)      FC bias (padded).
    out_ref: (Bp, Op)     logits (padded; sliced back in glue).
    gx_ref:  (4, T, Bp, H) VMEM scratch for the hoisted input projection."""
    T, Bp, E = x_ref.shape
    H = whh_ref.shape[1]

    # ---- Hoisted input projection: one MXU-shaped matmul per gate over all
    # timesteps, with the bias folded in (nothing broadcast inside the loop).
    x2d = x_ref[...].reshape(T * Bp, E)
    for k in range(4):
        gx = (
            jnp.dot(x2d, wih_ref[k], preferred_element_type=jnp.float32)
            + b_ref[k]
        )
        gx_ref[k] = gx.reshape(T, Bp, H)

    w_i = whh_ref[0]
    w_f = whh_ref[1]
    w_g = whh_ref[2]
    w_o = whh_ref[3]

    h0 = jnp.zeros((Bp, H), jnp.float32)
    c0 = jnp.zeros((Bp, H), jnp.float32)

    # ---- Recurrence: only the h @ W_hh_gate matmuls + gate nonlinearities
    # remain per step.  Per-gate weights => no sub-vreg lane slicing.
    def step(t, carry):
        h, c = carry
        i_g = jax.nn.sigmoid(
            gx_ref[0, t] + jnp.dot(h, w_i, preferred_element_type=jnp.float32))
        f_g = jax.nn.sigmoid(
            gx_ref[1, t] + jnp.dot(h, w_f, preferred_element_type=jnp.float32))
        g_g = jnp.tanh(
            gx_ref[2, t] + jnp.dot(h, w_g, preferred_element_type=jnp.float32))
        o_g = jax.nn.sigmoid(
            gx_ref[3, t] + jnp.dot(h, w_o, preferred_element_type=jnp.float32))
        c_new = f_g * c + i_g * g_g
        h_new = o_g * jnp.tanh(c_new)
        return h_new, c_new

    # Fully unrolled: T is small and static, gives LLO cross-step visibility.
    h_last, _ = lax.fori_loop(0, T, step, (h0, c0), unroll=True)

    # ---- Final FC on the last timestep's hidden state (lane-dense store).
    out_ref[...] = (
        jnp.dot(h_last, wfc_ref[...], preferred_element_type=jnp.float32)
        + bfc_ref[...]
    )


def sentiment_forward(tokens, emb_table, w_ih, w_hh, b_ih, b_hh, w_fc, b_fc):
    """tokens: (B, T) int32.  Params in PyTorch layout:
    w_ih (4H, E), w_hh (4H, H), b_ih/b_hh (4H,), w_fc (O, H), b_fc (O,).
    Returns (B, O) float32 logits."""
    B, T = tokens.shape
    E = emb_table.shape[1]
    H = w_hh.shape[1]
    O = w_fc.shape[0]

    SUB, LANE = 8, 128                      # f32 sublane / lane multiples
    Bp = ((max(B, SUB) + SUB - 1) // SUB) * SUB
    Op = ((max(O, LANE) + LANE - 1) // LANE) * LANE

    # Embedding gather directly in time-major order -> no transpose copy.
    embedded = jnp.take(emb_table, tokens.T, axis=0).astype(jnp.float32)  # (T, B, E)
    embedded = jnp.pad(embedded, ((0, 0), (0, Bp - B), (0, 0)))           # (T, Bp, E)

    # Per-gate, pre-transposed LSTM weights; combined bias.  Gate order i,f,g,o.
    Wih = jnp.transpose(w_ih.reshape(4, H, E), (0, 2, 1)).astype(jnp.float32)  # (4, E, H)
    Whh = jnp.transpose(w_hh.reshape(4, H, H), (0, 2, 1)).astype(jnp.float32)  # (4, H, H)
    bias = (b_ih + b_hh).reshape(4, 1, H).astype(jnp.float32)                  # (4, 1, H)

    # FC weights padded to a 128-lane-dense output.
    Wfc = jnp.zeros((H, Op), jnp.float32).at[:, :O].set(w_fc.T.astype(jnp.float32))
    bfc = jnp.zeros((1, Op), jnp.float32).at[:, :O].set(b_fc.reshape(1, O).astype(jnp.float32))

    vmem = pl.BlockSpec(memory_space=pltpu.MemorySpace.VMEM)
    out = pl.pallas_call(
        lstm_fc_kernel,
        out_shape=jax.ShapeDtypeStruct((Bp, Op), jnp.float32),
        in_specs=[vmem] * 6,
        out_specs=vmem,
        scratch_shapes=[pltpu.VMEM((4, T, Bp, H), jnp.float32)],
        compiler_params=pltpu.CompilerParams(vmem_limit_bytes=64 * 1024 * 1024),
    )(embedded, Wih, Whh, bias, Wfc, bfc)

    return out[:B, :O]


def reference_forward(tokens, emb_table, w_ih, w_hh, b_ih, b_hh, w_fc, b_fc):
    """Pure-JAX reference matching torch.nn.LSTM (batch_first) semantics."""
    embedded = jnp.take(emb_table, tokens, axis=0)  # (B, T, E)
    B, T, _ = embedded.shape
    H = w_hh.shape[1]
    b = b_ih + b_hh
    h = jnp.zeros((B, H), jnp.float32)
    c = jnp.zeros((B, H), jnp.float32)
    for t in range(T):
        x_t = embedded[:, t, :]
        gates = x_t @ w_ih.T + h @ w_hh.T + b
        i_g = jax.nn.sigmoid(gates[:, 0 * H:1 * H])
        f_g = jax.nn.sigmoid(gates[:, 1 * H:2 * H])
        g_g = jnp.tanh(gates[:, 2 * H:3 * H])
        o_g = jax.nn.sigmoid(gates[:, 3 * H:4 * H])
        c = f_g * c + i_g * g_g
        h = o_g * jnp.tanh(c)
    return h @ w_fc.T + b_fc


if __name__ == "__main__":
    # Small, deterministic shapes consistent with the module.
    vocab_size = 50
    embedding_dim = 32
    hidden_dim = 32
    output_dim = 2
    batch = 2
    seq = 8

    key = jax.random.PRNGKey(0)
    k_tok, k_emb, k_ih, k_hh, k_bih, k_bhh, k_fc, k_bfc = jax.random.split(key, 8)

    tokens = jax.random.randint(k_tok, (batch, seq), 0, vocab_size, dtype=jnp.int32)

    scale = 0.1
    emb_table = scale * jax.random.normal(k_emb, (vocab_size, embedding_dim), jnp.float32)
    # PyTorch LSTM / Linear parameter layouts.
    w_ih = scale * jax.random.normal(k_ih, (4 * hidden_dim, embedding_dim), jnp.float32)
    w_hh = scale * jax.random.normal(k_hh, (4 * hidden_dim, hidden_dim), jnp.float32)
    b_ih = scale * jax.random.normal(k_bih, (4 * hidden_dim,), jnp.float32)
    b_hh = scale * jax.random.normal(k_bhh, (4 * hidden_dim,), jnp.float32)
    w_fc = scale * jax.random.normal(k_fc, (output_dim, hidden_dim), jnp.float32)
    b_fc = scale * jax.random.normal(k_bfc, (output_dim,), jnp.float32)

    out = sentiment_forward(tokens, emb_table, w_ih, w_hh, b_ih, b_hh, w_fc, b_fc)
    out = jax.block_until_ready(out)

    ref = reference_forward(tokens, emb_table, w_ih, w_hh, b_ih, b_hh, w_fc, b_fc)
    assert out.shape == (batch, output_dim), out.shape
    assert jnp.allclose(out, ref, atol=1e-4, rtol=1e-4), (out, ref)

    print("KERNEL_OK")
</pallas_src>

<mosaic_0001>
module attributes {stable_mosaic.version = 11 : i64} {
  func.func @lstm_fc_kernel(%arg0: memref<8x8x32xf32, #tpu.memory_space<vmem>>, %arg1: memref<4x32x32xf32, #tpu.memory_space<vmem>>, %arg2: memref<4x32x32xf32, #tpu.memory_space<vmem>>, %arg3: memref<4x1x32xf32, #tpu.memory_space<vmem>>, %arg4: memref<32x128xf32, #tpu.memory_space<vmem>>, %arg5: memref<1x128xf32, #tpu.memory_space<vmem>>, %arg6: memref<8x128xf32, #tpu.memory_space<vmem>>, %arg7: memref<4x8x8x32xf32, #tpu.memory_space<vmem>>) attributes {dimension_semantics = [], scalar_prefetch = 0 : i64, scratch_operands = 1 : i64, tpu.core_type = #tpu.core_type<tc>} {
    %c0 = arith.constant 0 : index
    %c0_0 = arith.constant 0 : index
    %c0_1 = arith.constant 0 : index
    %0 = vector.load %arg0[%c0, %c0_0, %c0_1] : memref<8x8x32xf32, #tpu.memory_space<vmem>>, vector<8x8x32xf32>
    %1 = vector.shape_cast %0 : vector<8x8x32xf32> to vector<64x32xf32>
    %c0_2 = arith.constant 0 : index
    %c0_3 = arith.constant 0 : index
    %c0_4 = arith.constant 0 : index
    %2 = vector.load %arg1[%c0_2, %c0_3, %c0_4] : memref<4x32x32xf32, #tpu.memory_space<vmem>>, vector<1x32x32xf32>
    %3 = vector.shape_cast %2 : vector<1x32x32xf32> to vector<32x32xf32>
    %cst = arith.constant dense<0.000000e+00> : vector<64x32xf32>
    %4 = tpu.matmul %1, %3, %cst {dimension_numbers = #tpu.dot_dimension_numbers<[1], [0], [0], [1], [0, 0, 1, 1], [], []>} : vector<64x32xf32>, vector<32x32xf32>, vector<64x32xf32> -> vector<64x32xf32>
    %c0_5 = arith.constant 0 : index
    %c0_6 = arith.constant 0 : index
    %c0_7 = arith.constant 0 : index
    %5 = vector.load %arg3[%c0_5, %c0_6, %c0_7] : memref<4x1x32xf32, #tpu.memory_space<vmem>>, vector<1x1x32xf32>
    %6 = vector.shape_cast %5 : vector<1x1x32xf32> to vector<1x32xf32>
    %7 = vector.broadcast %6 : vector<1x32xf32> to vector<64x32xf32>
    %8 = arith.addf %4, %7 : vector<64x32xf32>
    %9 = vector.shape_cast %8 : vector<64x32xf32> to vector<8x8x32xf32>
    %c0_8 = arith.constant 0 : index
    %c0_9 = arith.constant 0 : index
    %c0_10 = arith.constant 0 : index
    %c0_11 = arith.constant 0 : index
    %10 = vector.load %arg7[%c0_8, %c0_9, %c0_10, %c0_11] : memref<4x8x8x32xf32, #tpu.memory_space<vmem>>, vector<1x8x8x32xf32>
    %11 = vector.shape_cast %10 : vector<1x8x8x32xf32> to vector<8x8x32xf32>
    %12 = vector.shape_cast %9 : vector<8x8x32xf32> to vector<1x8x8x32xf32>
    tpu.vector_store %arg7[%c0_8, %c0_9, %c0_10, %c0_11], %12 {strides = array<i32>} : memref<4x8x8x32xf32, #tpu.memory_space<vmem>>, vector<1x8x8x32xf32>,
    %c1 = arith.constant 1 : index
    %c0_12 = arith.constant 0 : index
    %c0_13 = arith.constant 0 : index
    %13 = vector.load %arg1[%c1, %c0_12, %c0_13] : memref<4x32x32xf32, #tpu.memory_space<vmem>>, vector<1x32x32xf32>
    %14 = vector.shape_cast %13 : vector<1x32x32xf32> to vector<32x32xf32>
    %cst_14 = arith.constant dense<0.000000e+00> : vector<64x32xf32>
    %15 = tpu.matmul %1, %14, %cst_14 {dimension_numbers = #tpu.dot_dimension_numbers<[1], [0], [0], [1], [0, 0, 1, 1], [], []>} : vector<64x32xf32>, vector<32x32xf32>, vector<64x32xf32> -> vector<64x32xf32>
    %c1_15 = arith.constant 1 : index
    %c0_16 = arith.constant 0 : index
    %c0_17 = arith.constant 0 : index
    %16 = vector.load %arg3[%c1_15, %c0_16, %c0_17] : memref<4x1x32xf32, #tpu.memory_space<vmem>>, vector<1x1x32xf32>
    %17 = vector.shape_cast %16 : vector<1x1x32xf32> to vector<1x32xf32>
    %18 = vector.broadcast %17 : vector<1x32xf32> to vector<64x32xf32>
    %19 = arith.addf %15, %18 : vector<64x32xf32>
    %20 = vector.shape_cast %19 : vector<64x32xf32> to vector<8x8x32xf32>
    %c1_18 = arith.constant 1 : index
    %c0_19 = arith.constant 0 : index
    %c0_20 = arith.constant 0 : index
    %c0_21 = arith.constant 0 : index
    %21 = vector.load %arg7[%c1_18, %c0_19, %c0_20, %c0_21] : memref<4x8x8x32xf32, #tpu.memory_space<vmem>>, vector<1x8x8x32xf32>
    %22 = vector.shape_cast %21 : vector<1x8x8x32xf32> to vector<8x8x32xf32>
    %23 = vector.shape_cast %20 : vector<8x8x32xf32> to vector<1x8x8x32xf32>
    tpu.vector_store %arg7[%c1_18, %c0_19, %c0_20, %c0_21], %23 {strides = array<i32>} : memref<4x8x8x32xf32, #tpu.memory_space<vmem>>, vector<1x8x8x32xf32>,
    %c2 = arith.constant 2 : index
    %c0_22 = arith.constant 0 : index
    %c0_23 = arith.constant 0 : index
    %24 = vector.load %arg1[%c2, %c0_22, %c0_23] : memref<4x32x32xf32, #tpu.memory_space<vmem>>, vector<1x32x32xf32>
    %25 = vector.shape_cast %24 : vector<1x32x32xf32> to vector<32x32xf32>
    %cst_24 = arith.constant dense<0.000000e+00> : vector<64x32xf32>
    %26 = tpu.matmul %1, %25, %cst_24 {dimension_numbers = #tpu.dot_dimension_numbers<[1], [0], [0], [1], [0, 0, 1, 1], [], []>} : vector<64x32xf32>, vector<32x32xf32>, vector<64x32xf32> -> vector<64x32xf32>
    %c2_25 = arith.constant 2 : index
    %c0_26 = arith.constant 0 : index
    %c0_27 = arith.constant 0 : index
    %27 = vector.load %arg3[%c2_25, %c0_26, %c0_27] : memref<4x1x32xf32, #tpu.memory_space<vmem>>, vector<1x1x32xf32>
    %28 = vector.shape_cast %27 : vector<1x1x32xf32> to vector<1x32xf32>
    %29 = vector.broadcast %28 : vector<1x32xf32> to vector<64x32xf32>
    %30 = arith.addf %26, %29 : vector<64x32xf32>
    %31 = vector.shape_cast %30 : vector<64x32xf32> to vector<8x8x32xf32>
    %c2_28 = arith.constant 2 : index
    %c0_29 = arith.constant 0 : index
    %c0_30 = arith.constant 0 : index
    %c0_31 = arith.constant 0 : index
    %32 = vector.load %arg7[%c2_28, %c0_29, %c0_30, %c0_31] : memref<4x8x8x32xf32, #tpu.memory_space<vmem>>, vector<1x8x8x32xf32>
    %33 = vector.shape_cast %32 : vector<1x8x8x32xf32> to vector<8x8x32xf32>
    %34 = vector.shape_cast %31 : vector<8x8x32xf32> to vector<1x8x8x32xf32>
    tpu.vector_store %arg7[%c2_28, %c0_29, %c0_30, %c0_31], %34 {strides = array<i32>} : memref<4x8x8x32xf32, #tpu.memory_space<vmem>>, vector<1x8x8x32xf32>,
    %c3 = arith.constant 3 : index
    %c0_32 = arith.constant 0 : index
    %c0_33 = arith.constant 0 : index
    %35 = vector.load %arg1[%c3, %c0_32, %c0_33] : memref<4x32x32xf32, #tpu.memory_space<vmem>>, vector<1x32x32xf32>
    %36 = vector.shape_cast %35 : vector<1x32x32xf32> to vector<32x32xf32>
    %cst_34 = arith.constant dense<0.000000e+00> : vector<64x32xf32>
    %37 = tpu.matmul %1, %36, %cst_34 {dimension_numbers = #tpu.dot_dimension_numbers<[1], [0], [0], [1], [0, 0, 1, 1], [], []>} : vector<64x32xf32>, vector<32x32xf32>, vector<64x32xf32> -> vector<64x32xf32>
    %c3_35 = arith.constant 3 : index
    %c0_36 = arith.constant 0 : index
    %c0_37 = arith.constant 0 : index
    %38 = vector.load %arg3[%c3_35, %c0_36, %c0_37] : memref<4x1x32xf32, #tpu.memory_space<vmem>>, vector<1x1x32xf32>
    %39 = vector.shape_cast %38 : vector<1x1x32xf32> to vector<1x32xf32>
    %40 = vector.broadcast %39 : vector<1x32xf32> to vector<64x32xf32>
    %41 = arith.addf %37, %40 : vector<64x32xf32>
    %42 = vector.shape_cast %41 : vector<64x32xf32> to vector<8x8x32xf32>
    %c3_38 = arith.constant 3 : index
    %c0_39 = arith.constant 0 : index
    %c0_40 = arith.constant 0 : index
    %c0_41 = arith.constant 0 : index
    %43 = vector.load %arg7[%c3_38, %c0_39, %c0_40, %c0_41] : memref<4x8x8x32xf32, #tpu.memory_space<vmem>>, vector<1x8x8x32xf32>
    %44 = vector.shape_cast %43 : vector<1x8x8x32xf32> to vector<8x8x32xf32>
    %45 = vector.shape_cast %42 : vector<8x8x32xf32> to vector<1x8x8x32xf32>
    tpu.vector_store %arg7[%c3_38, %c0_39, %c0_40, %c0_41], %45 {strides = array<i32>} : memref<4x8x8x32xf32, #tpu.memory_space<vmem>>, vector<1x8x8x32xf32>,
    %c0_42 = arith.constant 0 : index
    %c0_43 = arith.constant 0 : index
    %c0_44 = arith.constant 0 : index
    %46 = vector.load %arg2[%c0_42, %c0_43, %c0_44] : memref<4x32x32xf32, #tpu.memory_space<vmem>>, vector<1x32x32xf32>
    %47 = vector.shape_cast %46 : vector<1x32x32xf32> to vector<32x32xf32>
    %c1_45 = arith.constant 1 : index
    %c0_46 = arith.constant 0 : index
    %c0_47 = arith.constant 0 : index
    %48 = vector.load %arg2[%c1_45, %c0_46, %c0_47] : memref<4x32x32xf32, #tpu.memory_space<vmem>>, vector<1x32x32xf32>
    %49 = vector.shape_cast %48 : vector<1x32x32xf32> to vector<32x32xf32>
    %c2_48 = arith.constant 2 : index
    %c0_49 = arith.constant 0 : index
    %c0_50 = arith.constant 0 : index
    %50 = vector.load %arg2[%c2_48, %c0_49, %c0_50] : memref<4x32x32xf32, #tpu.memory_space<vmem>>, vector<1x32x32xf32>
    %51 = vector.shape_cast %50 : vector<1x32x32xf32> to vector<32x32xf32>
    %c3_51 = arith.constant 3 : index
    %c0_52 = arith.constant 0 : index
    %c0_53 = arith.constant 0 : index
    %52 = vector.load %arg2[%c3_51, %c0_52, %c0_53] : memref<4x32x32xf32, #tpu.memory_space<vmem>>, vector<1x32x32xf32>
    %53 = vector.shape_cast %52 : vector<1x32x32xf32> to vector<32x32xf32>
    %cst_54 = arith.constant 0.000000e+00 : f32
    %54 = vector.broadcast %cst_54 : f32 to vector<8x32xf32>
    %cst_55 = arith.constant 0.000000e+00 : f32
    %55 = vector.broadcast %cst_55 : f32 to vector<8x32xf32>
    %c0_i32 = arith.constant 0 : i32
    %c0_56 = arith.constant 0 : index
    %56 = arith.index_cast %c0_i32 : i32 to index
    %c0_57 = arith.constant 0 : index
    %c0_58 = arith.constant 0 : index
    %57 = vector.load %arg7[%c0_56, %56, %c0_57, %c0_58] : memref<4x8x8x32xf32, #tpu.memory_space<vmem>>, vector<1x1x8x32xf32>
    %58 = vector.shape_cast %57 : vector<1x1x8x32xf32> to vector<8x32xf32>
    %cst_59 = arith.constant dense<0.000000e+00> : vector<8x32xf32>
    %59 = tpu.matmul %54, %47, %cst_59 {dimension_numbers = #tpu.dot_dimension_numbers<[1], [0], [0], [1], [0, 0, 1, 1], [], []>} : vector<8x32xf32>, vector<32x32xf32>, vector<8x32xf32> -> vector<8x32xf32>
    %60 = arith.addf %58, %59 : vector<8x32xf32>
    %61 = arith.negf %60 : vector<8x32xf32>
    %62 = math.exp %61 : vector<8x32xf32>
    %cst_60 = arith.constant 1.000000e+00 : f32
    %63 = vector.broadcast %cst_60 : f32 to vector<8x32xf32>
    %64 = arith.addf %63, %62 : vector<8x32xf32>
    %65 = arith.divf %63, %64 : vector<8x32xf32>
    %c1_61 = arith.constant 1 : index
    %66 = arith.index_cast %c0_i32 : i32 to index
    %c0_62 = arith.constant 0 : index
    %c0_63 = arith.constant 0 : index
    %67 = vector.load %arg7[%c1_61, %66, %c0_62, %c0_63] : memref<4x8x8x32xf32, #tpu.memory_space<vmem>>, vector<1x1x8x32xf32>
    %68 = vector.shape_cast %67 : vector<1x1x8x32xf32> to vector<8x32xf32>
    %cst_64 = arith.constant dense<0.000000e+00> : vector<8x32xf32>
    %69 = tpu.matmul %54, %49, %cst_64 {dimension_numbers = #tpu.dot_dimension_numbers<[1], [0], [0], [1], [0, 0, 1, 1], [], []>} : vector<8x32xf32>, vector<32x32xf32>, vector<8x32xf32> -> vector<8x32xf32>
    %70 = arith.addf %68, %69 : vector<8x32xf32>
    %71 = arith.negf %70 : vector<8x32xf32>
    %72 = math.exp %71 : vector<8x32xf32>
    %cst_65 = arith.constant 1.000000e+00 : f32
    %73 = vector.broadcast %cst_65 : f32 to vector<8x32xf32>
    %74 = arith.addf %73, %72 : vector<8x32xf32>
    %75 = arith.divf %73, %74 : vector<8x32xf32>
    %c2_66 = arith.constant 2 : index
    %76 = arith.index_cast %c0_i32 : i32 to index
    %c0_67 = arith.constant 0 : index
    %c0_68 = arith.constant 0 : index
    %77 = vector.load %arg7[%c2_66, %76, %c0_67, %c0_68] : memref<4x8x8x32xf32, #tpu.memory_space<vmem>>, vector<1x1x8x32xf32>
    %78 = vector.shape_cast %77 : vector<1x1x8x32xf32> to vector<8x32xf32>
    %cst_69 = arith.constant dense<0.000000e+00> : vector<8x32xf32>
    %79 = tpu.matmul %54, %51, %cst_69 {dimension_numbers = #tpu.dot_dimension_numbers<[1], [0], [0], [1], [0, 0, 1, 1], [], []>} : vector<8x32xf32>, vector<32x32xf32>, vector<8x32xf32> -> vector<8x32xf32>
    %80 = arith.addf %78, %79 : vector<8x32xf32>
    %81 = math.tanh %80 : vector<8x32xf32>
    %c3_70 = arith.constant 3 : index
    %82 = arith.index_cast %c0_i32 : i32 to index
    %c0_71 = arith.constant 0 : index
    %c0_72 = arith.constant 0 : index
    %83 = vector.load %arg7[%c3_70, %82, %c0_71, %c0_72] : memref<4x8x8x32xf32, #tpu.memory_space<vmem>>, vector<1x1x8x32xf32>
    %84 = vector.shape_cast %83 : vector<1x1x8x32xf32> to vector<8x32xf32>
    %cst_73 = arith.constant dense<0.000000e+00> : vector<8x32xf32>
    %85 = tpu.matmul %54, %53, %cst_73 {dimension_numbers = #tpu.dot_dimension_numbers<[1], [0], [0], [1], [0, 0, 1, 1], [], []>} : vector<8x32xf32>, vector<32x32xf32>, vector<8x32xf32> -> vector<8x32xf32>
    %86 = arith.addf %84, %85 : vector<8x32xf32>
    %87 = arith.negf %86 : vector<8x32xf32>
    %88 = math.exp %87 : vector<8x32xf32>
    %cst_74 = arith.constant 1.000000e+00 : f32
    %89 = vector.broadcast %cst_74 : f32 to vector<8x32xf32>
    %90 = arith.addf %89, %88 : vector<8x32xf32>
    %91 = arith.divf %89, %90 : vector<8x32xf32>
    %92 = arith.mulf %75, %55 : vector<8x32xf32>
    %93 = arith.mulf %65, %81 : vector<8x32xf32>
    %94 = arith.addf %92, %93 : vector<8x32xf32>
    %95 = math.tanh %94 : vector<8x32xf32>
    %96 = arith.mulf %91, %95 : vector<8x32xf32>
    %c1_i32 = arith.constant 1 : i32
    %c0_75 = arith.constant 0 : index
    %97 = arith.index_cast %c1_i32 : i32 to index
    %c0_76 = arith.constant 0 : index
    %c0_77 = arith.constant 0 : index
    %98 = vector.load %arg7[%c0_75, %97, %c0_76, %c0_77] : memref<4x8x8x32xf32, #tpu.memory_space<vmem>>, vector<1x1x8x32xf32>
    %99 = vector.shape_cast %98 : vector<1x1x8x32xf32> to vector<8x32xf32>
    %cst_78 = arith.constant dense<0.000000e+00> : vector<8x32xf32>
    %100 = tpu.matmul %96, %47, %cst_78 {dimension_numbers = #tpu.dot_dimension_numbers<[1], [0], [0], [1], [0, 0, 1, 1], [], []>} : vector<8x32xf32>, vector<32x32xf32>, vector<8x32xf32> -> vector<8x32xf32>
    %101 = arith.addf %99, %100 : vector<8x32xf32>
    %102 = arith.negf %101 : vector<8x32xf32>
    %103 = math.exp %102 : vector<8x32xf32>
    %cst_79 = arith.constant 1.000000e+00 : f32
    %104 = vector.broadcast %cst_79 : f32 to vector<8x32xf32>
    %105 = arith.addf %104, %103 : vector<8x32xf32>
    %106 = arith.divf %104, %105 : vector<8x32xf32>
    %c1_80 = arith.constant 1 : index
    %107 = arith.index_cast %c1_i32 : i32 to index
    %c0_81 = arith.constant 0 : index
    %c0_82 = arith.constant 0 : index
    %108 = vector.load %arg7[%c1_80, %107, %c0_81, %c0_82] : memref<4x8x8x32xf32, #tpu.memory_space<vmem>>, vector<1x1x8x32xf32>
    %109 = vector.shape_cast %108 : vector<1x1x8x32xf32> to vector<8x32xf32>
    %cst_83 = arith.constant dense<0.000000e+00> : vector<8x32xf32>
    %110 = tpu.matmul %96, %49, %cst_83 {dimension_numbers = #tpu.dot_dimension_numbers<[1], [0], [0], [1], [0, 0, 1, 1], [], []>} : vector<8x32xf32>, vector<32x32xf32>, vector<8x32xf32> -> vector<8x32xf32>
    %111 = arith.addf %109, %110 : vector<8x32xf32>
    %112 = arith.negf %111 : vector<8x32xf32>
    %113 = math.exp %112 : vector<8x32xf32>
    %cst_84 = arith.constant 1.000000e+00 : f32
    %114 = vector.broadcast %cst_84 : f32 to vector<8x32xf32>
    %115 = arith.addf %114, %113 : vector<8x32xf32>
    %116 = arith.divf %114, %115 : vector<8x32xf32>
    %c2_85 = arith.constant 2 : index
    %117 = arith.index_cast %c1_i32 : i32 to index
    %c0_86 = arith.constant 0 : index
    %c0_87 = arith.constant 0 : index
    %118 = vector.load %arg7[%c2_85, %117, %c0_86, %c0_87] : memref<4x8x8x32xf32, #tpu.memory_space<vmem>>, vector<1x1x8x32xf32>
    %119 = vector.shape_cast %118 : vector<1x1x8x32xf32> to vector<8x32xf32>
    %cst_88 = arith.constant dense<0.000000e+00> : vector<8x32xf32>
    %120 = tpu.matmul %96, %51, %cst_88 {dimension_numbers = #tpu.dot_dimension_numbers<[1], [0], [0], [1], [0, 0, 1, 1], [], []>} : vector<8x32xf32>, vector<32x32xf32>, vector<8x32xf32> -> vector<8x32xf32>
    %121 = arith.addf %119, %120 : vector<8x32xf32>
    %122 = math.tanh %121 : vector<8x32xf32>
    %c3_89 = arith.constant 3 : index
    %123 = arith.index_cast %c1_i32 : i32 to index
    %c0_90 = arith.constant 0 : index
    %c0_91 = arith.constant 0 : index
    %124 = vector.load %arg7[%c3_89, %123, %c0_90, %c0_91] : memref<4x8x8x32xf32, #tpu.memory_space<vmem>>, vector<1x1x8x32xf32>
    %125 = vector.shape_cast %124 : vector<1x1x8x32xf32> to vector<8x32xf32>
    %cst_92 = arith.constant dense<0.000000e+00> : vector<8x32xf32>
    %126 = tpu.matmul %96, %53, %cst_92 {dimension_numbers = #tpu.dot_dimension_numbers<[1], [0], [0], [1], [0, 0, 1, 1], [], []>} : vector<8x32xf32>, vector<32x32xf32>, vector<8x32xf32> -> vector<8x32xf32>
    %127 = arith.addf %125, %126 : vector<8x32xf32>
    %128 = arith.negf %127 : vector<8x32xf32>
    %129 = math.exp %128 : vector<8x32xf32>
    %cst_93 = arith.constant 1.000000e+00 : f32
    %130 = vector.broadcast %cst_93 : f32 to vector<8x32xf32>
    %131 = arith.addf %130, %129 : vector<8x32xf32>
    %132 = arith.divf %130, %131 : vector<8x32xf32>
    %133 = arith.mulf %116, %94 : vector<8x32xf32>
    %134 = arith.mulf %106, %122 : vector<8x32xf32>
    %135 = arith.addf %133, %134 : vector<8x32xf32>
    %136 = math.tanh %135 : vector<8x32xf32>
    %137 = arith.mulf %132, %136 : vector<8x32xf32>
    %c2_i32 = arith.constant 2 : i32
    %c0_94 = arith.constant 0 : index
    %138 = arith.index_cast %c2_i32 : i32 to index
    %c0_95 = arith.constant 0 : index
    %c0_96 = arith.constant 0 : index
    %139 = vector.load %arg7[%c0_94, %138, %c0_95, %c0_96] : memref<4x8x8x32xf32, #tpu.memory_space<vmem>>, vector<1x1x8x32xf32>
    %140 = vector.shape_cast %139 : vector<1x1x8x32xf32> to vector<8x32xf32>
    %cst_97 = arith.constant dense<0.000000e+00> : vector<8x32xf32>
    %141 = tpu.matmul %137, %47, %cst_97 {dimension_numbers = #tpu.dot_dimension_numbers<[1], [0], [0], [1], [0, 0, 1, 1], [], []>} : vector<8x32xf32>, vector<32x32xf32>, vector<8x32xf32> -> vector<8x32xf32>
    %142 = arith.addf %140, %141 : vector<8x32xf32>
    %143 = arith.negf %142 : vector<8x32xf32>
    %144 = math.exp %143 : vector<8x32xf32>
    %cst_98 = arith.constant 1.000000e+00 : f32
    %145 = vector.broadcast %cst_98 : f32 to vector<8x32xf32>
    %146 = arith.addf %145, %144 : vector<8x32xf32>
    %147 = arith.divf %145, %146 : vector<8x32xf32>
    %c1_99 = arith.constant 1 : index
    %148 = arith.index_cast %c2_i32 : i32 to index
    %c0_100 = arith.constant 0 : index
    %c0_101 = arith.constant 0 : index
    %149 = vector.load %arg7[%c1_99, %148, %c0_100, %c0_101] : memref<4x8x8x32xf32, #tpu.memory_space<vmem>>, vector<1x1x8x32xf32>
    %150 = vector.shape_cast %149 : vector<1x1x8x32xf32> to vector<8x32xf32>
    %cst_102 = arith.constant dense<0.000000e+00> : vector<8x32xf32>
    %151 = tpu.matmul %137, %49, %cst_102 {dimension_numbers = #tpu.dot_dimension_numbers<[1], [0], [0], [1], [0, 0, 1, 1], [], []>} : vector<8x32xf32>, vector<32x32xf32>, vector<8x32xf32> -> vector<8x32xf32>
    %152 = arith.addf %150, %151 : vector<8x32xf32>
    %153 = arith.negf %152 : vector<8x32xf32>
    %154 = math.exp %153 : vector<8x32xf32>
    %cst_103 = arith.constant 1.000000e+00 : f32
    %155 = vector.broadcast %cst_103 : f32 to vector<8x32xf32>
    %156 = arith.addf %155, %154 : vector<8x32xf32>
    %157 = arith.divf %155, %156 : vector<8x32xf32>
    %c2_104 = arith.constant 2 : index
    %158 = arith.index_cast %c2_i32 : i32 to index
    %c0_105 = arith.constant 0 : index
    %c0_106 = arith.constant 0 : index
    %159 = vector.load %arg7[%c2_104, %158, %c0_105, %c0_106] : memref<4x8x8x32xf32, #tpu.memory_space<vmem>>, vector<1x1x8x32xf32>
    %160 = vector.shape_cast %159 : vector<1x1x8x32xf32> to vector<8x32xf32>
    %cst_107 = arith.constant dense<0.000000e+00> : vector<8x32xf32>
    %161 = tpu.matmul %137, %51, %cst_107 {dimension_numbers = #tpu.dot_dimension_numbers<[1], [0], [0], [1], [0, 0, 1, 1], [], []>} : vector<8x32xf32>, vector<32x32xf32>, vector<8x32xf32> -> vector<8x32xf32>
    %162 = arith.addf %160, %161 : vector<8x32xf32>
    %163 = math.tanh %162 : vector<8x32xf32>
    %c3_108 = arith.constant 3 : index
    %164 = arith.index_cast %c2_i32 : i32 to index
    %c0_109 = arith.constant 0 : index
    %c0_110 = arith.constant 0 : index
    %165 = vector.load %arg7[%c3_108, %164, %c0_109, %c0_110] : memref<4x8x8x32xf32, #tpu.memory_space<vmem>>, vector<1x1x8x32xf32>
    %166 = vector.shape_cast %165 : vector<1x1x8x32xf32> to vector<8x32xf32>
    %cst_111 = arith.constant dense<0.000000e+00> : vector<8x32xf32>
    %167 = tpu.matmul %137, %53, %cst_111 {dimension_numbers = #tpu.dot_dimension_numbers<[1], [0], [0], [1], [0, 0, 1, 1], [], []>} : vector<8x32xf32>, vector<32x32xf32>, vector<8x32xf32> -> vector<8x32xf32>
    %168 = arith.addf %166, %167 : vector<8x32xf32>
    %169 = arith.negf %168 : vector<8x32xf32>
    %170 = math.exp %169 : vector<8x32xf32>
    %cst_112 = arith.constant 1.000000e+00 : f32
    %171 = vector.broadcast %cst_112 : f32 to vector<8x32xf32>
    %172 = arith.addf %171, %170 : vector<8x32xf32>
    %173 = arith.divf %171, %172 : vector<8x32xf32>
    %174 = arith.mulf %157, %135 : vector<8x32xf32>
    %175 = arith.mulf %147, %163 : vector<8x32xf32>
    %176 = arith.addf %174, %175 : vector<8x32xf32>
    %177 = math.tanh %176 : vector<8x32xf32>
    %178 = arith.mulf %173, %177 : vector<8x32xf32>
    %c3_i32 = arith.constant 3 : i32
    %c0_113 = arith.constant 0 : index
    %179 = arith.index_cast %c3_i32 : i32 to index
    %c0_114 = arith.constant 0 : index
    %c0_115 = arith.constant 0 : index
    %180 = vector.load %arg7[%c0_113, %179, %c0_114, %c0_115] : memref<4x8x8x32xf32, #tpu.memory_space<vmem>>, vector<1x1x8x32xf32>
    %181 = vector.shape_cast %180 : vector<1x1x8x32xf32> to vector<8x32xf32>
    %cst_116 = arith.constant dense<0.000000e+00> : vector<8x32xf32>
    %182 = tpu.matmul %178, %47, %cst_116 {dimension_numbers = #tpu.dot_dimension_numbers<[1], [0], [0], [1], [0, 0, 1, 1], [], []>} : vector<8x32xf32>, vector<32x32xf32>, vector<8x32xf32> -> vector<8x32xf32>
    %183 = arith.addf %181, %182 : vector<8x32xf32>
    %184 = arith.negf %183 : vector<8x32xf32>
    %185 = math.exp %184 : vector<8x32xf32>
    %cst_117 = arith.constant 1.000000e+00 : f32
    %186 = vector.broadcast %cst_117 : f32 to vector<8x32xf32>
    %187 = arith.addf %186, %185 : vector<8x32xf32>
    %188 = arith.divf %186, %187 : vector<8x32xf32>
    %c1_118 = arith.constant 1 : index
    %189 = arith.index_cast %c3_i32 : i32 to index
    %c0_119 = arith.constant 0 : index
    %c0_120 = arith.constant 0 : index
    %190 = vector.load %arg7[%c1_118, %189, %c0_119, %c0_120] : memref<4x8x8x32xf32, #tpu.memory_space<vmem>>, vector<1x1x8x32xf32>
    %191 = vector.shape_cast %190 : vector<1x1x8x32xf32> to vector<8x32xf32>
    %cst_121 = arith.constant dense<0.000000e+00> : vector<8x32xf32>
    %192 = tpu.matmul %178, %49, %cst_121 {dimension_numbers = #tpu.dot_dimension_numbers<[1], [0], [0], [1], [0, 0, 1, 1], [], []>} : vector<8x32xf32>, vector<32x32xf32>, vector<8x32xf32> -> vector<8x32xf32>
    %193 = arith.addf %191, %192 : vector<8x32xf32>
    %194 = arith.negf %193 : vector<8x32xf32>
    %195 = math.exp %194 : vector<8x32xf32>
    %cst_122 = arith.constant 1.000000e+00 : f32
    %196 = vector.broadcast %cst_122 : f32 to vector<8x32xf32>
    %197 = arith.addf %196, %195 : vector<8x32xf32>
    %198 = arith.divf %196, %197 : vector<8x32xf32>
    %c2_123 = arith.constant 2 : index
    %199 = arith.index_cast %c3_i32 : i32 to index
    %c0_124 = arith.constant 0 : index
    %c0_125 = arith.constant 0 : index
    %200 = vector.load %arg7[%c2_123, %199, %c0_124, %c0_125] : memref<4x8x8x32xf32, #tpu.memory_space<vmem>>, vector<1x1x8x32xf32>
    %201 = vector.shape_cast %200 : vector<1x1x8x32xf32> to vector<8x32xf32>
    %cst_126 = arith.constant dense<0.000000e+00> : vector<8x32xf32>
    %202 = tpu.matmul %178, %51, %cst_126 {dimension_numbers = #tpu.dot_dimension_numbers<[1], [0], [0], [1], [0, 0, 1, 1], [], []>} : vector<8x32xf32>, vector<32x32xf32>, vector<8x32xf32> -> vector<8x32xf32>
    %203 = arith.addf %201, %202 : vector<8x32xf32>
    %204 = math.tanh %203 : vector<8x32xf32>
    %c3_127 = arith.constant 3 : index
    %205 = arith.index_cast %c3_i32 : i32 to index
    %c0_128 = arith.constant 0 : index
    %c0_129 = arith.constant 0 : index
    %206 = vector.load %arg7[%c3_127, %205, %c0_128, %c0_129] : memref<4x8x8x32xf32, #tpu.memory_space<vmem>>, vector<1x1x8x32xf32>
    %207 = vector.shape_cast %206 : vector<1x1x8x32xf32> to vector<8x32xf32>
    %cst_130 = arith.constant dense<0.000000e+00> : vector<8x32xf32>
    %208 = tpu.matmul %178, %53, %cst_130 {dimension_numbers = #tpu.dot_dimension_numbers<[1], [0], [0], [1], [0, 0, 1, 1], [], []>} : vector<8x32xf32>, vector<32x32xf32>, vector<8x32xf32> -> vector<8x32xf32>
    %209 = arith.addf %207, %208 : vector<8x32xf32>
    %210 = arith.negf %209 : vector<8x32xf32>
    %211 = math.exp %210 : vector<8x32xf32>
    %cst_131 = arith.constant 1.000000e+00 : f32
    %212 = vector.broadcast %cst_131 : f32 to vector<8x32xf32>
    %213 = arith.addf %212, %211 : vector<8x32xf32>
    %214 = arith.divf %212, %213 : vector<8x32xf32>
    %215 = arith.mulf %198, %176 : vector<8x32xf32>
    %216 = arith.mulf %188, %204 : vector<8x32xf32>
    %217 = arith.addf %215, %216 : vector<8x32xf32>
    %218 = math.tanh %217 : vector<8x32xf32>
    %219 = arith.mulf %214, %218 : vector<8x32xf32>
    %c4_i32 = arith.constant 4 : i32
    %c0_132 = arith.constant 0 : index
    %220 = arith.index_cast %c4_i32 : i32 to index
    %c0_133 = arith.constant 0 : index
    %c0_134 = arith.constant 0 : index
    %221 = vector.load %arg7[%c0_132, %220, %c0_133, %c0_134] : memref<4x8x8x32xf32, #tpu.memory_space<vmem>>, vector<1x1x8x32xf32>
    %222 = vector.shape_cast %221 : vector<1x1x8x32xf32> to vector<8x32xf32>
    %cst_135 = arith.constant dense<0.000000e+00> : vector<8x32xf32>
    %223 = tpu.matmul %219, %47, %cst_135 {dimension_numbers = #tpu.dot_dimension_numbers<[1], [0], [0], [1], [0, 0, 1, 1], [], []>} : vector<8x32xf32>, vector<32x32xf32>, vector<8x32xf32> -> vector<8x32xf32>
    %224 = arith.addf %222, %223 : vector<8x32xf32>
    %225 = arith.negf %224 : vector<8x32xf32>
    %226 = math.exp %225 : vector<8x32xf32>
    %cst_136 = arith.constant 1.000000e+00 : f32
    %227 = vector.broadcast %cst_136 : f32 to vector<8x32xf32>
    %228 = arith.addf %227, %226 : vector<8x32xf32>
    %229 = arith.divf %227, %228 : vector<8x32xf32>
    %c1_137 = arith.constant 1 : index
    %230 = arith.index_cast %c4_i32 : i32 to index
    %c0_138 = arith.constant 0 : index
    %c0_139 = arith.constant 0 : index
    %231 = vector.load %arg7[%c1_137, %230, %c0_138, %c0_139] : memref<4x8x8x32xf32, #tpu.memory_space<vmem>>, vector<1x1x8x32xf32>
    %232 = vector.shape_cast %231 : vector<1x1x8x32xf32> to vector<8x32xf32>
    %cst_140 = arith.constant dense<0.000000e+00> : vector<8x32xf32>
    %233 = tpu.matmul %219, %49, %cst_140 {dimension_numbers = #tpu.dot_dimension_numbers<[1], [0], [0], [1], [0, 0, 1, 1], [], []>} : vector<8x32xf32>, vector<32x32xf32>, vector<8x32xf32> -> vector<8x32xf32>
    %234 = arith.addf %232, %233 : vector<8x32xf32>
    %235 = arith.negf %234 : vector<8x32xf32>
    %236 = math.exp %235 : vector<8x32xf32>
    %cst_141 = arith.constant 1.000000e+00 : f32
    %237 = vector.broadcast %cst_141 : f32 to vector<8x32xf32>
    %238 = arith.addf %237, %236 : vector<8x32xf32>
    %239 = arith.divf %237, %238 : vector<8x32xf32>
    %c2_142 = arith.constant 2 : index
    %240 = arith.index_cast %c4_i32 : i32 to index
    %c0_143 = arith.constant 0 : index
    %c0_144 = arith.constant 0 : index
    %241 = vector.load %arg7[%c2_142, %240, %c0_143, %c0_144] : memref<4x8x8x32xf32, #tpu.memory_space<vmem>>, vector<1x1x8x32xf32>
    %242 = vector.shape_cast %241 : vector<1x1x8x32xf32> to vector<8x32xf32>
    %cst_145 = arith.constant dense<0.000000e+00> : vector<8x32xf32>
    %243 = tpu.matmul %219, %51, %cst_145 {dimension_numbers = #tpu.dot_dimension_numbers<[1], [0], [0], [1], [0, 0, 1, 1], [], []>} : vector<8x32xf32>, vector<32x32xf32>, vector<8x32xf32> -> vector<8x32xf32>
    %244 = arith.addf %242, %243 : vector<8x32xf32>
    %245 = math.tanh %244 : vector<8x32xf32>
    %c3_146 = arith.constant 3 : index
    %246 = arith.index_cast %c4_i32 : i32 to index
    %c0_147 = arith.constant 0 : index
    %c0_148 = arith.constant 0 : index
    %247 = vector.load %arg7[%c3_146, %246, %c0_147, %c0_148] : memref<4x8x8x32xf32, #tpu.memory_space<vmem>>, vector<1x1x8x32xf32>
    %248 = vector.shape_cast %247 : vector<1x1x8x32xf32> to vector<8x32xf32>
    %cst_149 = arith.constant dense<0.000000e+00> : vector<8x32xf32>
    %249 = tpu.matmul %219, %53, %cst_149 {dimension_numbers = #tpu.dot_dimension_numbers<[1], [0], [0], [1], [0, 0, 1, 1], [], []>} : vector<8x32xf32>, vector<32x32xf32>, vector<8x32xf32> -> vector<8x32xf32>
    %250 = arith.addf %248, %249 : vector<8x32xf32>
    %251 = arith.negf %250 : vector<8x32xf32>
    %252 = math.exp %251 : vector<8x32xf32>
    %cst_150 = arith.constant 1.000000e+00 : f32
    %253 = vector.broadcast %cst_150 : f32 to vector<8x32xf32>
    %254 = arith.addf %253, %252 : vector<8x32xf32>
    %255 = arith.divf %253, %254 : vector<8x32xf32>
    %256 = arith.mulf %239, %217 : vector<8x32xf32>
    %257 = arith.mulf %229, %245 : vector<8x32xf32>
    %258 = arith.addf %256, %257 : vector<8x32xf32>
    %259 = math.tanh %258 : vector<8x32xf32>
    %260 = arith.mulf %255, %259 : vector<8x32xf32>
    %c5_i32 = arith.constant 5 : i32
    %c0_151 = arith.constant 0 : index
    %261 = arith.index_cast %c5_i32 : i32 to index
    %c0_152 = arith.constant 0 : index
    %c0_153 = arith.constant 0 : index
    %262 = vector.load %arg7[%c0_151, %261, %c0_152, %c0_153] : memref<4x8x8x32xf32, #tpu.memory_space<vmem>>, vector<1x1x8x32xf32>
    %263 = vector.shape_cast %262 : vector<1x1x8x32xf32> to vector<8x32xf32>
    %cst_154 = arith.constant dense<0.000000e+00> : vector<8x32xf32>
    %264 = tpu.matmul %260, %47, %cst_154 {dimension_numbers = #tpu.dot_dimension_numbers<[1], [0], [0], [1], [0, 0, 1, 1], [], []>} : vector<8x32xf32>, vector<32x32xf32>, vector<8x32xf32> -> vector<8x32xf32>
    %265 = arith.addf %263, %264 : vector<8x32xf32>
    %266 = arith.negf %265 : vector<8x32xf32>
    %267 = math.exp %266 : vector<8x32xf32>
    %cst_155 = arith.constant 1.000000e+00 : f32
    %268 = vector.broadcast %cst_155 : f32 to vector<8x32xf32>
    %269 = arith.addf %268, %267 : vector<8x32xf32>
    %270 = arith.divf %268, %269 : vector<8x32xf32>
    %c1_156 = arith.constant 1 : index
    %271 = arith.index_cast %c5_i32 : i32 to index
    %c0_157 = arith.constant 0 : index
    %c0_158 = arith.constant 0 : index
    %272 = vector.load %arg7[%c1_156, %271, %c0_157, %c0_158] : memref<4x8x8x32xf32, #tpu.memory_space<vmem>>, vector<1x1x8x32xf32>
    %273 = vector.shape_cast %272 : vector<1x1x8x32xf32> to vector<8x32xf32>
    %cst_159 = arith.constant dense<0.000000e+00> : vector<8x32xf32>
    %274 = tpu.matmul %260, %49, %cst_159 {dimension_numbers = #tpu.dot_dimension_numbers<[1], [0], [0], [1], [0, 0, 1, 1], [], []>} : vector<8x32xf32>, vector<32x32xf32>, vector<8x32xf32> -> vector<8x32xf32>
    %275 = arith.addf %273, %274 : vector<8x32xf32>
    %276 = arith.negf %275 : vector<8x32xf32>
    %277 = math.exp %276 : vector<8x32xf32>
    %cst_160 = arith.constant 1.000000e+00 : f32
    %278 = vector.broadcast %cst_160 : f32 to vector<8x32xf32>
    %279 = arith.addf %278, %277 : vector<8x32xf32>
    %280 = arith.divf %278, %279 : vector<8x32xf32>
    %c2_161 = arith.constant 2 : index
    %281 = arith.index_cast %c5_i32 : i32 to index
    %c0_162 = arith.constant 0 : index
    %c0_163 = arith.constant 0 : index
    %282 = vector.load %arg7[%c2_161, %281, %c0_162, %c0_163] : memref<4x8x8x32xf32, #tpu.memory_space<vmem>>, vector<1x1x8x32xf32>
    %283 = vector.shape_cast %282 : vector<1x1x8x32xf32> to vector<8x32xf32>
    %cst_164 = arith.constant dense<0.000000e+00> : vector<8x32xf32>
    %284 = tpu.matmul %260, %51, %cst_164 {dimension_numbers = #tpu.dot_dimension_numbers<[1], [0], [0], [1], [0, 0, 1, 1], [], []>} : vector<8x32xf32>, vector<32x32xf32>, vector<8x32xf32> -> vector<8x32xf32>
    %285 = arith.addf %283, %284 : vector<8x32xf32>
    %286 = math.tanh %285 : vector<8x32xf32>
    %c3_165 = arith.constant 3 : index
    %287 = arith.index_cast %c5_i32 : i32 to index
    %c0_166 = arith.constant 0 : index
    %c0_167 = arith.constant 0 : index
    %288 = vector.load %arg7[%c3_165, %287, %c0_166, %c0_167] : memref<4x8x8x32xf32, #tpu.memory_space<vmem>>, vector<1x1x8x32xf32>
    %289 = vector.shape_cast %288 : vector<1x1x8x32xf32> to vector<8x32xf32>
    %cst_168 = arith.constant dense<0.000000e+00> : vector<8x32xf32>
    %290 = tpu.matmul %260, %53, %cst_168 {dimension_numbers = #tpu.dot_dimension_numbers<[1], [0], [0], [1], [0, 0, 1, 1], [], []>} : vector<8x32xf32>, vector<32x32xf32>, vector<8x32xf32> -> vector<8x32xf32>
    %291 = arith.addf %289, %290 : vector<8x32xf32>
    %292 = arith.negf %291 : vector<8x32xf32>
    %293 = math.exp %292 : vector<8x32xf32>
    %cst_169 = arith.constant 1.000000e+00 : f32
    %294 = vector.broadcast %cst_169 : f32 to vector<8x32xf32>
    %295 = arith.addf %294, %293 : vector<8x32xf32>
    %296 = arith.divf %294, %295 : vector<8x32xf32>
    %297 = arith.mulf %280, %258 : vector<8x32xf32>
    %298 = arith.mulf %270, %286 : vector<8x32xf32>
    %299 = arith.addf %297, %298 : vector<8x32xf32>
    %300 = math.tanh %299 : vector<8x32xf32>
    %301 = arith.mulf %296, %300 : vector<8x32xf32>
    %c6_i32 = arith.constant 6 : i32
    %c0_170 = arith.constant 0 : index
    %302 = arith.index_cast %c6_i32 : i32 to index
    %c0_171 = arith.constant 0 : index
    %c0_172 = arith.constant 0 : index
    %303 = vector.load %arg7[%c0_170, %302, %c0_171, %c0_172] : memref<4x8x8x32xf32, #tpu.memory_space<vmem>>, vector<1x1x8x32xf32>
    %304 = vector.shape_cast %303 : vector<1x1x8x32xf32> to vector<8x32xf32>
    %cst_173 = arith.constant dense<0.000000e+00> : vector<8x32xf32>
    %305 = tpu.matmul %301, %47, %cst_173 {dimension_numbers = #tpu.dot_dimension_numbers<[1], [0], [0], [1], [0, 0, 1, 1], [], []>} : vector<8x32xf32>, vector<32x32xf32>, vector<8x32xf32> -> vector<8x32xf32>
    %306 = arith.addf %304, %305 : vector<8x32xf32>
    %307 = arith.negf %306 : vector<8x32xf32>
    %308 = math.exp %307 : vector<8x32xf32>
    %cst_174 = arith.constant 1.000000e+00 : f32
    %309 = vector.broadcast %cst_174 : f32 to vector<8x32xf32>
    %310 = arith.addf %309, %308 : vector<8x32xf32>
    %311 = arith.divf %309, %310 : vector<8x32xf32>
    %c1_175 = arith.constant 1 : index
    %312 = arith.index_cast %c6_i32 : i32 to index
    %c0_176 = arith.constant 0 : index
    %c0_177 = arith.constant 0 : index
    %313 = vector.load %arg7[%c1_175, %312, %c0_176, %c0_177] : memref<4x8x8x32xf32, #tpu.memory_space<vmem>>, vector<1x1x8x32xf32>
    %314 = vector.shape_cast %313 : vector<1x1x8x32xf32> to vector<8x32xf32>
    %cst_178 = arith.constant dense<0.000000e+00> : vector<8x32xf32>
    %315 = tpu.matmul %301, %49, %cst_178 {dimension_numbers = #tpu.dot_dimension_numbers<[1], [0], [0], [1], [0, 0, 1, 1], [], []>} : vector<8x32xf32>, vector<32x32xf32>, vector<8x32xf32> -> vector<8x32xf32>
    %316 = arith.addf %314, %315 : vector<8x32xf32>
    %317 = arith.negf %316 : vector<8x32xf32>
    %318 = math.exp %317 : vector<8x32xf32>
    %cst_179 = arith.constant 1.000000e+00 : f32
    %319 = vector.broadcast %cst_179 : f32 to vector<8x32xf32>
    %320 = arith.addf %319, %318 : vector<8x32xf32>
    %321 = arith.divf %319, %320 : vector<8x32xf32>
    %c2_180 = arith.constant 2 : index
    %322 = arith.index_cast %c6_i32 : i32 to index
    %c0_181 = arith.constant 0 : index
    %c0_182 = arith.constant 0 : index
    %323 = vector.load %arg7[%c2_180, %322, %c0_181, %c0_182] : memref<4x8x8x32xf32, #tpu.memory_space<vmem>>, vector<1x1x8x32xf32>
    %324 = vector.shape_cast %323 : vector<1x1x8x32xf32> to vector<8x32xf32>
    %cst_183 = arith.constant dense<0.000000e+00> : vector<8x32xf32>
    %325 = tpu.matmul %301, %51, %cst_183 {dimension_numbers = #tpu.dot_dimension_numbers<[1], [0], [0], [1], [0, 0, 1, 1], [], []>} : vector<8x32xf32>, vector<32x32xf32>, vector<8x32xf32> -> vector<8x32xf32>
    %326 = arith.addf %324, %325 : vector<8x32xf32>
    %327 = math.tanh %326 : vector<8x32xf32>
    %c3_184 = arith.constant 3 : index
    %328 = arith.index_cast %c6_i32 : i32 to index
    %c0_185 = arith.constant 0 : index
    %c0_186 = arith.constant 0 : index
    %329 = vector.load %arg7[%c3_184, %328, %c0_185, %c0_186] : memref<4x8x8x32xf32, #tpu.memory_space<vmem>>, vector<1x1x8x32xf32>
    %330 = vector.shape_cast %329 : vector<1x1x8x32xf32> to vector<8x32xf32>
    %cst_187 = arith.constant dense<0.000000e+00> : vector<8x32xf32>
    %331 = tpu.matmul %301, %53, %cst_187 {dimension_numbers = #tpu.dot_dimension_numbers<[1], [0], [0], [1], [0, 0, 1, 1], [], []>} : vector<8x32xf32>, vector<32x32xf32>, vector<8x32xf32> -> vector<8x32xf32>
    %332 = arith.addf %330, %331 : vector<8x32xf32>
    %333 = arith.negf %332 : vector<8x32xf32>
    %334 = math.exp %333 : vector<8x32xf32>
    %cst_188 = arith.constant 1.000000e+00 : f32
    %335 = vector.broadcast %cst_188 : f32 to vector<8x32xf32>
    %336 = arith.addf %335, %334 : vector<8x32xf32>
    %337 = arith.divf %335, %336 : vector<8x32xf32>
    %338 = arith.mulf %321, %299 : vector<8x32xf32>
    %339 = arith.mulf %311, %327 : vector<8x32xf32>
    %340 = arith.addf %338, %339 : vector<8x32xf32>
    %341 = math.tanh %340 : vector<8x32xf32>
    %342 = arith.mulf %337, %341 : vector<8x32xf32>
    %c7_i32 = arith.constant 7 : i32
    %c0_189 = arith.constant 0 : index
    %343 = arith.index_cast %c7_i32 : i32 to index
    %c0_190 = arith.constant 0 : index
    %c0_191 = arith.constant 0 : index
    %344 = vector.load %arg7[%c0_189, %343, %c0_190, %c0_191] : memref<4x8x8x32xf32, #tpu.memory_space<vmem>>, vector<1x1x8x32xf32>
    %345 = vector.shape_cast %344 : vector<1x1x8x32xf32> to vector<8x32xf32>
    %cst_192 = arith.constant dense<0.000000e+00> : vector<8x32xf32>
    %346 = tpu.matmul %342, %47, %cst_192 {dimension_numbers = #tpu.dot_dimension_numbers<[1], [0], [0], [1], [0, 0, 1, 1], [], []>} : vector<8x32xf32>, vector<32x32xf32>, vector<8x32xf32> -> vector<8x32xf32>
    %347 = arith.addf %345, %346 : vector<8x32xf32>
    %348 = arith.negf %347 : vector<8x32xf32>
    %349 = math.exp %348 : vector<8x32xf32>
    %cst_193 = arith.constant 1.000000e+00 : f32
    %350 = vector.broadcast %cst_193 : f32 to vector<8x32xf32>
    %351 = arith.addf %350, %349 : vector<8x32xf32>
    %352 = arith.divf %350, %351 : vector<8x32xf32>
    %c1_194 = arith.constant 1 : index
    %353 = arith.index_cast %c7_i32 : i32 to index
    %c0_195 = arith.constant 0 : index
    %c0_196 = arith.constant 0 : index
    %354 = vector.load %arg7[%c1_194, %353, %c0_195, %c0_196] : memref<4x8x8x32xf32, #tpu.memory_space<vmem>>, vector<1x1x8x32xf32>
    %355 = vector.shape_cast %354 : vector<1x1x8x32xf32> to vector<8x32xf32>
    %cst_197 = arith.constant dense<0.000000e+00> : vector<8x32xf32>
    %356 = tpu.matmul %342, %49, %cst_197 {dimension_numbers = #tpu.dot_dimension_numbers<[1], [0], [0], [1], [0, 0, 1, 1], [], []>} : vector<8x32xf32>, vector<32x32xf32>, vector<8x32xf32> -> vector<8x32xf32>
    %357 = arith.addf %355, %356 : vector<8x32xf32>
    %358 = arith.negf %357 : vector<8x32xf32>
    %359 = math.exp %358 : vector<8x32xf32>
    %cst_198 = arith.constant 1.000000e+00 : f32
    %360 = vector.broadcast %cst_198 : f32 to vector<8x32xf32>
    %361 = arith.addf %360, %359 : vector<8x32xf32>
    %362 = arith.divf %360, %361 : vector<8x32xf32>
    %c2_199 = arith.constant 2 : index
    %363 = arith.index_cast %c7_i32 : i32 to index
    %c0_200 = arith.constant 0 : index
    %c0_201 = arith.constant 0 : index
    %364 = vector.load %arg7[%c2_199, %363, %c0_200, %c0_201] : memref<4x8x8x32xf32, #tpu.memory_space<vmem>>, vector<1x1x8x32xf32>
    %365 = vector.shape_cast %364 : vector<1x1x8x32xf32> to vector<8x32xf32>
    %cst_202 = arith.constant dense<0.000000e+00> : vector<8x32xf32>
    %366 = tpu.matmul %342, %51, %cst_202 {dimension_numbers = #tpu.dot_dimension_numbers<[1], [0], [0], [1], [0, 0, 1, 1], [], []>} : vector<8x32xf32>, vector<32x32xf32>, vector<8x32xf32> -> vector<8x32xf32>
    %367 = arith.addf %365, %366 : vector<8x32xf32>
    %368 = math.tanh %367 : vector<8x32xf32>
    %c3_203 = arith.constant 3 : index
    %369 = arith.index_cast %c7_i32 : i32 to index
    %c0_204 = arith.constant 0 : index
    %c0_205 = arith.constant 0 : index
    %370 = vector.load %arg7[%c3_203, %369, %c0_204, %c0_205] : memref<4x8x8x32xf32, #tpu.memory_space<vmem>>, vector<1x1x8x32xf32>
    %371 = vector.shape_cast %370 : vector<1x1x8x32xf32> to vector<8x32xf32>
    %cst_206 = arith.constant dense<0.000000e+00> : vector<8x32xf32>
    %372 = tpu.matmul %342, %53, %cst_206 {dimension_numbers = #tpu.dot_dimension_numbers<[1], [0], [0], [1], [0, 0, 1, 1], [], []>} : vector<8x32xf32>, vector<32x32xf32>, vector<8x32xf32> -> vector<8x32xf32>
    %373 = arith.addf %371, %372 : vector<8x32xf32>
    %374 = arith.negf %373 : vector<8x32xf32>
    %375 = math.exp %374 : vector<8x32xf32>
    %cst_207 = arith.constant 1.000000e+00 : f32
    %376 = vector.broadcast %cst_207 : f32 to vector<8x32xf32>
    %377 = arith.addf %376, %375 : vector<8x32xf32>
    %378 = arith.divf %376, %377 : vector<8x32xf32>
    %379 = arith.mulf %362, %340 : vector<8x32xf32>
    %380 = arith.mulf %352, %368 : vector<8x32xf32>
    %381 = arith.addf %379, %380 : vector<8x32xf32>
    %382 = math.tanh %381 : vector<8x32xf32>
    %383 = arith.mulf %378, %382 : vector<8x32xf32>
    %c8_i32 = arith.constant 8 : i32
    %c0_208 = arith.constant 0 : index
    %c0_209 = arith.constant 0 : index
    %384 = vector.load %arg4[%c0_208, %c0_209] : memref<32x128xf32, #tpu.memory_space<vmem>>, vector<32x128xf32>
    %cst_210 = arith.constant dense<0.000000e+00> : vector<8x128xf32>
    %385 = tpu.matmul %383, %384, %cst_210 {dimension_numbers = #tpu.dot_dimension_numbers<[1], [0], [0], [1], [0, 0, 1, 1], [], []>} : vector<8x32xf32>, vector<32x128xf32>, vector<8x128xf32> -> vector<8x128xf32>
    %c0_211 = arith.constant 0 : index
    %c0_212 = arith.constant 0 : index
    %386 = vector.load %arg5[%c0_211, %c0_212] : memref<1x128xf32, #tpu.memory_space<vmem>>, vector<1x128xf32>
    %387 = vector.broadcast %386 : vector<1x128xf32> to vector<8x128xf32>
    %388 = arith.addf %385, %387 : vector<8x128xf32>
    %c0_213 = arith.constant 0 : index
    %c0_214 = arith.constant 0 : index
    %389 = vector.load %arg6[%c0_213, %c0_214] : memref<8x128xf32, #tpu.memory_space<vmem>>, vector<8x128xf32>
    tpu.vector_store %arg6[%c0_213, %c0_214], %388 {strides = array<i32>} : memref<8x128xf32, #tpu.memory_space<vmem>>, vector<8x128xf32>,
    return
  }
}

</mosaic_0001>

<bundles_post_ra>
// kernel: tpu_custom_call.1
= control target key start
LH: loop header
LB: loop body
LE: loop exit
PB: predicated region body
PF: predicated region fallthrough
CT: control target
= control target key end

     0   :  { %11 = vsyncpa [#allocation4], 0  ;;  %s5090_s0 = inlined_call_operand.hbm [shape: f32[8,8,32], index: 0, kind: input, shape index: {}]   ;;  %s5091_s1 = inlined_call_operand.hbm [shape: f32[4,32,32], index: 1, kind: input, shape index: {}]   ;;  %s5092_s2 = inlined_call_operand.hbm [shape: f32[4,32,32], index: 2, kind: input, shape index: {}]   ;;  %s5093_s3 = inlined_call_operand.hbm [shape: f32[4,1,32], index: 3, kind: input, shape index: {}]   ;;  %s5094_s4 = inlined_call_operand.hbm [shape: f32[32,128], index: 4, kind: input, shape index: {}]   ;;  %s5095_s5 = inlined_call_operand.hbm [shape: f32[1,128], index: 5, kind: input, shape index: {}]   ;;  %s5096_s6 = inlined_call_operand.hbm [shape: f32[8,128], index: 6, kind: output, shape index: {}]  }
   0x1   :  { %12 = vsyncpa [#allocation7], 0 }
   0x2   :  { %13 = vsyncpa [#allocation10], 0 }
   0x3   :  { %14 = vsyncpa [#allocation13], 0 }
   0x4   :  { %15 = vsyncpa [#allocation5], 0  ;;  %s4594_s21 = smov [#allocation6]   ;;  %s4595_s23 = smov [#allocation9]  }
   0x5   :  { %s33_s22 = sshll.u32 %s4594_s21, 4  ;;  %s57_s24 = sshll.u32 %s4595_s23, 4  ;;  %s34_s22 = int_to_ptr.vmem [resolvable:$true] %s33_s22  ;;  %s4643_s24 = int_to_ptr.vmem [resolvable:$true] %s57_s24 }
   0x6   :  { %s4430_s27 = scalar_lea.hbm %s5091_s1, 2048 }
   0x7   :  { %p4431_p0 = scmp.ne.s32.totalorder %s5091_s1, %s4430_s27  ;;  %p4434_p1 = scmp.lt.u32.totalorder %s4430_s27, %s5091_s1 }
   0x9   :  { %p4436_p2 = pnand %p4434_p1, %p4431_p0 }
   0xb   :  { %4439 = shalt.err (!%p4436_p2)
}
   0xc   :  { %s4440_s8 = scalar_lea.vmem %s34_s22, 2048  ;;  %p4445_p4 = scmp.lt.s32.totalorder %s34_s22, %s34_s22 }
   0xd   :  { %p4441_p3 = scmp.ne.s32.totalorder %s34_s22, %s4440_s8  ;;  %p4446_p5 = scmp.lt.s32.totalorder %s4440_s8, %s4440_s8 }
   0xf   :  { %p4447_p6 = por %p4446_p5, %p4445_p4 }
  0x11   :  { %p4448_p7 = pnand %p4447_p6, %p4441_p3 }
  0x13   :  { %4451 = shalt.err (!%p4448_p7)
}
  0x14   :  { %s4596_s9 = smov 128   ;;  %s4597_s10 = smov 8  }
  0x15   :  { %39 = dma.hbm_to_vmem [thread:$0]  %s5091_s1, 2048, %s34_s22, [#allocation7], %s4596_s9, %s4596_s9, %s4597_s10  }
  0x16   :  { %s4452_s15 = scalar_lea.hbm %s5093_s3, 64 }
  0x17   :  { %p4453_p8 = scmp.ne.s32.totalorder %s5093_s3, %s4452_s15  ;;  %p4456_p9 = scmp.lt.u32.totalorder %s4452_s15, %s5093_s3 }
  0x19   :  { %p4458_p10 = pnand %p4456_p9, %p4453_p8 }
  0x1b   :  { %4461 = shalt.err (!%p4458_p10)
}
  0x1c   :  { %s4462_s20 = scalar_lea.vmem %s4643_s24, 64  ;;  %p4467_p12 = scmp.lt.s32.totalorder %s4643_s24, %s4643_s24 }
  0x1d   :  { %p4463_p11 = scmp.ne.s32.totalorder %s4643_s24, %s4462_s20  ;;  %p4468_p13 = scmp.lt.s32.totalorder %s4462_s20, %s4462_s20 }
  0x1f   :  { %p4469_p0 = por %p4468_p13, %p4467_p12 }
  0x21   :  { %p4470_p1 = pnand %p4469_p0, %p4463_p11 }
  0x23   :  { %4473 = shalt.err (!%p4470_p1)
}
  0x24   :  { %s4598_s1 = smov 16   ;;  %s4599_s21 = smov 1  }
  0x25   :  { %63 = dma.hbm_to_vmem [thread:$0]  %s5093_s3, 64, %s4643_s24, [#allocation10], %s4598_s1, %s4598_s1, %s4599_s21  }
  0x26   :  { %s4600_s25 = smov [#allocation3]   ;;  %s4601_s27 = smov [#allocation8]  }
  0x27   :  { %s21_s26 = sshll.u32 %s4600_s25, 4  ;;  %s45_s28 = sshll.u32 %s4601_s27, 4  ;;  %s22_s26 = int_to_ptr.vmem [resolvable:$true] %s21_s26  ;;  %s4677_s28 = int_to_ptr.vmem [resolvable:$true] %s45_s28 }
  0x28   :  { %s4474_s7 = scalar_lea.hbm %s5090_s0, 1024 }
  0x29   :  { %p4475_p2 = scmp.ne.s32.totalorder %s5090_s0, %s4474_s7  ;;  %p4478_p3 = scmp.lt.u32.totalorder %s4474_s7, %s5090_s0 }
  0x2b   :  { %p4480_p4 = pnand %p4478_p3, %p4475_p2 }
  0x2d   :  { %4483 = shalt.err (!%p4480_p4)
}
  0x2e   :  { %s4484_s3 = scalar_lea.vmem %s22_s26, 1024  ;;  %p4489_p6 = scmp.lt.s32.totalorder %s22_s26, %s22_s26 }
  0x2f   :  { %p4485_p5 = scmp.ne.s32.totalorder %s22_s26, %s4484_s3  ;;  %p4490_p7 = scmp.lt.s32.totalorder %s4484_s3, %s4484_s3 }
  0x31   :  { %p4491_p8 = por %p4490_p7, %p4489_p6 }
  0x33   :  { %p4492_p9 = pnand %p4491_p8, %p4485_p5 }
  0x35   :  { %4495 = shalt.err (!%p4492_p9)
}
  0x36   :  { %27 = dma.hbm_to_vmem [thread:$0]  %s5090_s0, 1024, %s22_s26, [#allocation4], %s4596_s9, %s4596_s9, %s4597_s10  }
  0x37   :  { %s4496_s17 = scalar_lea.hbm %s5092_s2, 2048 }
  0x38   :  { %p4497_p10 = scmp.ne.s32.totalorder %s5092_s2, %s4496_s17  ;;  %p4500_p11 = scmp.lt.u32.totalorder %s4496_s17, %s5092_s2 }
  0x3a   :  { %p4502_p12 = pnand %p4500_p11, %p4497_p10 }
  0x3c   :  { %4505 = shalt.err (!%p4502_p12)
}
  0x3d   :  { %s4506_s21 = scalar_lea.vmem %s4677_s28, 2048  ;;  %p4511_p0 = scmp.lt.s32.totalorder %s4677_s28, %s4677_s28 }
  0x3e   :  { %p4507_p13 = scmp.ne.s32.totalorder %s4677_s28, %s4506_s21  ;;  %p4512_p1 = scmp.lt.s32.totalorder %s4506_s21, %s4506_s21 }
  0x40   :  { %p4513_p2 = por %p4512_p1, %p4511_p0 }
  0x42   :  { %p4514_p3 = pnand %p4513_p2, %p4507_p13 }
  0x44   :  { %4517 = shalt.err (!%p4514_p3)
}
  0x45   :  { %51 = dma.hbm_to_vmem [thread:$0]  %s5092_s2, 2048, %s4677_s28, [#allocation7], %s4596_s9, %s4596_s9, %s4597_s10  }
  0x46   :  { %s4602_s23 = smov [#allocation11]   ;;  %s4603_s26 = smov [#allocation12]  }
  0x47   :  { %s69_s25 = sshll.u32 %s4602_s23, 4  ;;  %s82_s27 = sshll.u32 %s4603_s26, 4  ;;  %s70_s25 = int_to_ptr.vmem [resolvable:$true] %s69_s25  ;;  %s83_s27 = int_to_ptr.vmem [resolvable:$true] %s82_s27 }
  0x48   :  { %s4518_s7 = scalar_lea.hbm %s5094_s4, 512 }
  0x49   :  { %p4519_p4 = scmp.ne.s32.totalorder %s5094_s4, %s4518_s7  ;;  %p4522_p5 = scmp.lt.u32.totalorder %s4518_s7, %s5094_s4 }
  0x4b   :  { %p4524_p6 = pnand %p4522_p5, %p4519_p4 }
  0x4d   :  { %4527 = shalt.err (!%p4524_p6)
}
  0x4e   :  { %s4528_s2 = scalar_lea.vmem %s70_s25, 512  ;;  %p4533_p8 = scmp.lt.s32.totalorder %s70_s25, %s70_s25 }
  0x4f   :  { %p4529_p7 = scmp.ne.s32.totalorder %s70_s25, %s4528_s2  ;;  %p4534_p9 = scmp.lt.s32.totalorder %s4528_s2, %s4528_s2 }
  0x51   :  { %p4535_p10 = por %p4534_p9, %p4533_p8 }
  0x53   :  { %p4536_p11 = pnand %p4535_p10, %p4529_p7 }
  0x55   :  { %4539 = shalt.err (!%p4536_p11)
}
  0x56   :  { %75 = dma.hbm_to_vmem [thread:$0]  %s5094_s4, 512, %s70_s25, [#allocation10], %s4596_s9, %s4596_s9, %s4597_s10  }
  0x57   :  { %s4540_s15 = scalar_lea.hbm %s5095_s5, 16 }
  0x58   :  { %p4541_p12 = scmp.ne.s32.totalorder %s5095_s5, %s4540_s15  ;;  %p4544_p13 = scmp.lt.u32.totalorder %s4540_s15, %s5095_s5 }
  0x5a   :  { %p4546_p0 = pnand %p4544_p13, %p4541_p12 }
  0x5c   :  { %4549 = shalt.err (!%p4546_p0)
}
  0x5d   :  { %s4550_s20 = scalar_lea.vmem %s83_s27, 16  ;;  %s4554_s1 = scalar_lea.vmem %s83_s27, 32 }
  0x5e   :  { %p4551_p1 = scmp.ne.s32.totalorder %s83_s27, %s4550_s20  ;;  %p4555_p2 = scmp.lt.s32.totalorder %s83_s27, %s83_s27 }
  0x5f   :  { %p4556_p3 = scmp.lt.s32.totalorder %s4554_s1, %s4550_s20 }
  0x61   :  { %p4557_p4 = por %p4556_p3, %p4555_p2 }
  0x63   :  { %p4558_p5 = pnand %p4557_p4, %p4551_p1 }
  0x65   :  { %4561 = shalt.err (!%p4558_p5)
}
  0x66   :  { %85 = dma.hbm_to_vmem [thread:$0]  %s5095_s5, 16, %s83_s27, [#allocation13]  }
  0x67   :  { %4584 = dma.done.wait [#allocation4], 1024  }
  0x68   :  { %4585 = vsyncadd [#allocation4], 4294966272 }
  0x69   :  { %4586 = dma.done.wait [#allocation7], 4096  }
  0x6a   :  { %4587 = vsyncadd [#allocation7], 4294963200 }
  0x6b   :  { %4588 = dma.done.wait [#allocation10], 576  }
  0x6c   :  { %4589 = vsyncadd [#allocation10], 4294966720 }
  0x6d   :  { %4590 = dma.done.wait [#allocation13], 16  }
  0x6e   :  { %4591 = vsyncadd [#allocation13], 4294967280  ;;  %v112_v0 = vld [vmem:[#allocation6] sm:$0xff]  ;;  %v113_v1 = vld [vmem:[#allocation6 + $0x8] sm:$0xff]  ;;  %vm123_vm0 = vcmask 261120   ;;  %v4604_v31 = vmov 0.0|0.0  }
  0x6f   :  { %v262_v2 = vld [vmem:[#allocation6 + $0x20] sm:$0xff]  ;;  %v4058_v3 = vpack.c.bf16 %v113_v1, %v112_v0  ;;  %v263_v4 = vld [vmem:[#allocation6 + $0x28] sm:$0xff]  ;;  %v114_v5 = vld [vmem:[#allocation6 + $0x10] sm:$0xff]  ;;  %vm4605_vm1 = vmmov 0   ;;  %v4606_v49 = vmov 0.0   ;;  %s4607_s5 = smov [#allocation14]  }
  0x70   :  { %v115_v6 = vld [vmem:[#allocation6 + $0x18] sm:$0xff]  ;;  %v4066_v7 = vpack.c.bf16 %v263_v4, %v262_v2  ;;  %v264_v9 = vld [vmem:[#allocation6 + $0x30] sm:$0xff]  ;;  %v104_v11 = vld [vmem:[#allocation3] sm:$0xff]  ;;  %s3300_s10 = sshll.u32 %s4607_s5, 4  ;;  %s3301_s10 = int_to_ptr.vmem [resolvable:$true] %s3300_s10 }
  0x71   :  { %v4062_v8 = vpack.c.bf16 %v115_v6, %v114_v5  ;;  %v265_v10 = vld [vmem:[#allocation6 + $0x38] sm:$0xff]  ;;  %4059 = vmatprep.subr.bf16.mxu0 %v4058_v3  ;;  %3623 = vmatprep.mubr.msk.f32.mxu0 %vm123_vm0, %v104_v11  ;;  %v389_v13 = vld [vmem:[#allocation6 + $0x40] sm:$0xff]  ;;  %v390_v14 = vld [vmem:[#allocation6 + $0x48] sm:$0xff]  ;;  %s4562_s21 = scalar_lea.vmem %s3301_s10, 128  ;;  %p4567_p7 = scmp.lt.s32.totalorder %s3301_s10, %s3301_s10 }
  0x72   :  { %v4070_v12 = vpack.c.bf16 %v265_v10, %v264_v9  ;;  %4067 = vmatprep.subr.bf16.mxu1 %v4066_v7  ;;  %4061 = vmatpush3.bf16.msra.mxu0 %v4058_v3  ;;  %v516_v15 = vld [vmem:[#allocation6 + $0x60] sm:$0xff]  ;;  %v517_v16 = vld [vmem:[#allocation6 + $0x68] sm:$0xff]  ;;  %v4074_v17 = vpack.c.bf16 %v390_v14, %v389_v13  ;;  %v391_v19 = vld [vmem:[#allocation6 + $0x50] sm:$0xff]  ;;  %p4563_p6 = scmp.ne.s32.totalorder %s3301_s10, %s4562_s21  ;;  %p4568_p8 = scmp.lt.s32.totalorder %s4562_s21, %s4562_s21 }
  0x73   :  { %4069 = vmatpush3.bf16.msra.mxu1 %v4066_v7  ;;  %4063 = vmatprep.subr.bf16.mxu0 %v4062_v8  ;;  %v4082_v18 = vpack.c.bf16 %v517_v16, %v516_v15  ;;  %v392_v20 = vld [vmem:[#allocation6 + $0x58] sm:$0xff]  ;;  %v105_v21 = vld [vmem:[#allocation3 + $0x8] sm:$0xff]  ;;  %v518_v22 = vld [vmem:[#allocation6 + $0x70] sm:$0xff] }
  0x74   :  { %4071 = vmatprep.subr.bf16.mxu1 %v4070_v12  ;;  %3643 = vmatprep.mubr.msk.f32.mxu1 %vm123_vm0, %v104_v11  ;;  %v519_v23 = vld [vmem:[#allocation6 + $0x78] sm:$0xff]  ;;  %v106_v24 = vld [vmem:[#allocation3 + $0x10] sm:$0xff]  ;;  %v4078_v25 = vpack.c.bf16 %v392_v20, %v391_v19  ;;  %v108_v28 = vld [vmem:[#allocation3 + $0x20] sm:$0xff]  ;;  %p4569_p9 = por %p4568_p8, %p4567_p7 }
  0x75   :  { %v4086_v26 = vpack.c.bf16 %v519_v23, %v518_v22  ;;  %v107_v27 = vld [vmem:[#allocation3 + $0x18] sm:$0xff]  ;;  %v109_v29 = vld [vmem:[#allocation3 + $0x28] sm:$0xff]  ;;  %v110_v30 = vld [vmem:[#allocation3 + $0x30] sm:$0xff] }
  0x76   :  { %4065 = vmatpush3.bf16.msra.mxu0 %v4062_v8  ;;  %v111_v32 = vld [vmem:[#allocation3 + $0x38] sm:$0xff]  ;;  %v642_v33 = vld [vmem:[#allocation8] sm:$0xff]  ;;  %v643_v34 = vld [vmem:[#allocation8 + $0x8] sm:$0xff]  ;;  %p4570_p10 = pnand %p4569_p9, %p4563_p6 }
  0x77   :  { %4073 = vmatpush3.bf16.msra.mxu1 %v4070_v12  ;;  %4075 = vmatprep.subr.bf16.mxu0 %v4074_v17  ;;  %v647_v35 = vld [vmem:[#allocation8 + $0x20] sm:$0xff]  ;;  %v648_v36 = vld [vmem:[#allocation8 + $0x28] sm:$0xff]  ;;  %v4760_v37 = vpack.c.bf16 %v643_v34, %v642_v33  ;;  %v644_v39 = vld [vmem:[#allocation8 + $0x10] sm:$0xff] }
  0x78   :  { %4083 = vmatprep.subr.bf16.mxu1 %v4082_v18  ;;  %v4763_v38 = vpack.c.bf16 %v648_v36, %v647_v35  ;;  %v645_v40 = vld [vmem:[#allocation8 + $0x18] sm:$0xff]  ;;  %v649_v41 = vld [vmem:[#allocation8 + $0x30] sm:$0xff]  ;;  %v652_v45 = vld [vmem:[#allocation8 + $0x40] sm:$0xff] }
  0x79   :  { %3624 = vmatmul.mubr.msk.f32.vlgmr.msra.gmra.mrb[0].mxu0 %vm123_vm0, %v105_v21  ;;  %v650_v42 = vld [vmem:[#allocation8 + $0x38] sm:$0xff]  ;;  %v4770_v43 = vpack.c.bf16 %v645_v40, %v644_v39  ;;  %v653_v46 = vld [vmem:[#allocation8 + $0x48] sm:$0xff]  ;;  %v657_v47 = vld [vmem:[#allocation8 + $0x60] sm:$0xff] }
  0x7a   :  { %3644 = vmatmul.mubr.msk.f32.vlgmr.msra.gmra.mrb[0].mxu1 %vm123_vm0, %v105_v21  ;;  %4077 = vmatpush3.bf16.msra.mxu0 %v4074_v17  ;;  %v4774_v44 = vpack.c.bf16 %v650_v42, %v649_v41  ;;  %v658_v48 = vld [vmem:[#allocation8 + $0x68] sm:$0xff]  ;;  %v4793_v50 = vpack.c.bf16 %v653_v46, %v652_v45  ;;  %v654_v52 = vld [vmem:[#allocation8 + $0x50] sm:$0xff]  ;;  %v655_v53 = vld [vmem:[#allocation8 + $0x58] sm:$0xff] }
  0x7b   :  { %4085 = vmatpush3.bf16.msra.mxu1 %v4082_v18  ;;  %3626 = vmatprep.mubr.msk.f32.mxu0 %vm123_vm0, %v106_v24  ;;  %v4797_v51 = vpack.c.bf16 %v658_v48, %v657_v47  ;;  %v659_v54 = vld [vmem:[#allocation8 + $0x70] sm:$0xff]  ;;  %v660_v55 = vld [vmem:[#allocation8 + $0x78] sm:$0xff]  ;;  %v4802_v56 = vpack.c.bf16 %v655_v53, %v654_v52  ;;  %v3312_v58 = vld [vmem:[#allocation9] ss:$0 sm:$0xff] }
  0x7c   :  { %3646 = vmatprep.mubr.msk.f32.mxu1 %vm123_vm0, %v106_v24  ;;  %4079 = vmatprep.subr.bf16.mxu0 %v4078_v25  ;;  %v4806_v57 = vpack.c.bf16 %v660_v55, %v659_v54  ;;  %v3321_v59 = vld [vmem:[#allocation9 + $0x1] ss:$0 sm:$0xff] }
  0x7d   :  { %3627 = vmatmul.mubr.msk.f32.gmra.mrb[2].mxu0 %vm123_vm0, %v107_v27  ;;  %4087 = vmatprep.subr.bf16.mxu1 %v4086_v26 }
  0x7e   :  { %3647 = vmatmul.mubr.msk.f32.gmra.mrb[2].mxu1 %vm123_vm0, %v107_v27  ;;  %3629 = vmatprep.mubr.msk.f32.mxu0 %vm123_vm0, %v108_v28 }
  0x7f   :  { %3649 = vmatprep.mubr.msk.f32.mxu1 %vm123_vm0, %v108_v28  ;;  %4081 = vmatpush3.bf16.msra.mxu0 %v4078_v25 }
  0x80   :  { %4089 = vmatpush3.bf16.msra.mxu1 %v4086_v26  ;;  %4090 = vmatprep.subr.bf16.mxu0 %v4604_v31 }
  0x81   :  { %3630 = vmatmul.mubr.msk.f32.gmra.mrb[4].mxu0 %vm123_vm0, %v109_v29  ;;  %4096 = vmatprep.subr.bf16.mxu1 %v4604_v31 }
  0x82   :  { %3650 = vmatmul.mubr.msk.f32.gmra.mrb[4].mxu1 %vm123_vm0, %v109_v29  ;;  %3632 = vmatprep.mubr.msk.f32.mxu0 %vm123_vm0, %v110_v30 }
  0x83   :  { %3652 = vmatprep.mubr.msk.f32.mxu1 %vm123_vm0, %v110_v30 }
  0x85   :  { %3633 = vmatmul.mubr.msk.f32.gmra.mrb[6].mxu0 %vm123_vm0, %v111_v32 }
  0x86   :  { %3653 = vmatmul.mubr.msk.f32.gmra.mrb[6].mxu1 %vm123_vm0, %v111_v32  ;;  %3663 = vmatprep.mubr.msk.f32.mxu0 %vm123_vm0, %v104_v11 }
  0x87   :  { %3683 = vmatprep.mubr.msk.f32.mxu1 %vm123_vm0, %v104_v11 }
  0x89   :  { %3664 = vmatmul.mubr.msk.f32.vlgmr.msra.gmra.mrb[8].mxu0 %vm123_vm0, %v105_v21 }
  0x8a   :  { %3684 = vmatmul.mubr.msk.f32.vlgmr.msra.gmra.mrb[8].mxu1 %vm123_vm0, %v105_v21  ;;  %4092 = vmatpush3.bf16.msra.mxu0 %v4760_v37 }
  0x8b   :  { %4098 = vmatpush3.bf16.msra.mxu1 %v4763_v38  ;;  %3666 = vmatprep.mubr.msk.f32.mxu0 %vm123_vm0, %v106_v24 }
  0x8c   :  { %3686 = vmatprep.mubr.msk.f32.mxu1 %vm123_vm0, %v106_v24  ;;  %4093 = vmatprep.subr.bf16.mxu0 %v4604_v31 }
  0x8d   :  { %3667 = vmatmul.mubr.msk.f32.gmra.mrb[10].mxu0 %vm123_vm0, %v107_v27  ;;  %4099 = vmatprep.subr.bf16.mxu1 %v4604_v31 }
  0x8e   :  { %3687 = vmatmul.mubr.msk.f32.gmra.mrb[10].mxu1 %vm123_vm0, %v107_v27  ;;  %3669 = vmatprep.mubr.msk.f32.mxu0 %vm123_vm0, %v108_v28  ;;  %v3330_v27 = vld [vmem:[#allocation9 + $0x2] ss:$0 sm:$0xff] }
  0x8f   :  { %3689 = vmatprep.mubr.msk.f32.mxu1 %vm123_vm0, %v108_v28  ;;  %4095 = vmatpush3.bf16.msra.mxu0 %v4770_v43 }
  0x90   :  { %4101 = vmatpush3.bf16.msra.mxu1 %v4774_v44  ;;  %4102 = vmatprep.subr.bf16.mxu0 %v4604_v31 }
  0x91   :  { %3670 = vmatmul.mubr.msk.f32.gmra.mrb[12].mxu0 %vm123_vm0, %v109_v29  ;;  %4108 = vmatprep.subr.bf16.mxu1 %v4604_v31 }
  0x92   :  { %3690 = vmatmul.mubr.msk.f32.gmra.mrb[12].mxu1 %vm123_vm0, %v109_v29  ;;  %3672 = vmatprep.mubr.msk.f32.mxu0 %vm123_vm0, %v110_v30  ;;  %v3339_v29 = vld [vmem:[#allocation9 + $0x3] ss:$0 sm:$0xff] }
  0x93   :  { %3692 = vmatprep.mubr.msk.f32.mxu1 %vm123_vm0, %v110_v30 }
  0x95   :  { %3673 = vmatmul.mubr.msk.f32.gmra.mrb[14].mxu0 %vm123_vm0, %v111_v32 }
  0x96   :  { %3693 = vmatmul.mubr.msk.f32.gmra.mrb[14].mxu1 %vm123_vm0, %v111_v32  ;;  %3703 = vmatprep.mubr.msk.f32.mxu0 %vm4605_vm1, %v4606_v49 }
  0x97   :  { %3714 = vmatprep.mubr.msk.f32.mxu1 %vm4605_vm1, %v4606_v49 }
  0x99   :  { %3704 = vmatmul.mubr.f32.vlgmr.msra.gmra.mrb[16].mxu0 %v4606_v49 }
  0x9a   :  { %3715 = vmatmul.mubr.f32.vlgmr.msra.gmra.mrb[16].mxu1 %v4606_v49  ;;  %4104 = vmatpush3.bf16.msra.mxu0 %v4793_v50 }
  0x9b   :  { %4110 = vmatpush3.bf16.msra.mxu1 %v4797_v51  ;;  %4105 = vmatprep.subr.bf16.mxu0 %v4604_v31 }
  0x9c   :  { %4111 = vmatprep.subr.bf16.mxu1 %v4604_v31  ;;  %3725 = vmatprep.mubr.msk.f32.mxu0 %vm4605_vm1, %v4606_v49 }
  0x9d   :  { %3736 = vmatprep.mubr.msk.f32.mxu1 %vm4605_vm1, %v4606_v49 }
  0x9e   :  { %4107 = vmatpush3.bf16.msra.mxu0 %v4802_v56 }
  0x9f   :  { %4113 = vmatpush3.bf16.msra.mxu1 %v4806_v57  ;;  %4114 = vmatprep.subr.bf16.mxu0 %v4604_v31 }
  0xa0   :  { %4120 = vmatprep.subr.bf16.mxu1 %v4604_v31 }
  0xa1   :  { %3726 = vmatmul.mubr.f32.vlgmr.msra.gmra.mrb[18].mxu0 %v4606_v49 }
  0xa2   :  { %3737 = vmatmul.mubr.f32.vlgmr.msra.gmra.mrb[18].mxu1 %v4606_v49  ;;  %4116 = vmatpush3.bf16.msra.mxu0 %v4760_v37 }
  0xa3   :  { %4122 = vmatpush3.bf16.msra.mxu1 %v4763_v38  ;;  %4117 = vmatprep.subr.bf16.mxu0 %v4604_v31 }
  0xa4   :  { %4123 = vmatprep.subr.bf16.mxu1 %v4604_v31  ;;  %3747 = vmatprep.mubr.msk.f32.mxu0 %vm4605_vm1, %v4606_v49 }
  0xa5   :  { %3758 = vmatprep.mubr.msk.f32.mxu1 %vm4605_vm1, %v4606_v49 }
  0xa6   :  { %4119 = vmatpush3.bf16.msra.mxu0 %v4770_v43 }
  0xa7   :  { %4125 = vmatpush3.bf16.msra.mxu1 %v4774_v44  ;;  %4126 = vmatprep.subr.bf16.mxu0 %v4604_v31 }
  0xa8   :  { %4132 = vmatprep.subr.bf16.mxu1 %v4604_v31 }
 0x14c   :  { %v3625_v60 = vpop.f32.mrb[0].mxu0 }
 0x14d   :  { %v220_v61 = vadd.f32 %v3625_v60, %v3312_v58  ;;  %v3645_v62 = vpop.f32.mrb[0].mxu1  ;;  %v214_v63 = vpop.f32.mrb[1].mxu0 }
 0x14e   :  { %v346_v0 = vadd.f32 %v3645_v62, %v3321_v59  ;;  %v215_v1 = vadd.f32 %v3312_v58, %v214_v63  ;;  %v340_v2 = vpop.f32.mrb[1].mxu1 }
 0x14f   :  { %254 = vst.msk [vmem:[#allocation2 + $0x8] sm:$0xff] %vm123_vm0, %v220_v61  ;;  %v341_v3 = vadd.f32 %v3321_v59, %v340_v2 }
 0x150   :  { %381 = vst.msk [vmem:[#allocation2 + $0x48] sm:$0xff] %vm123_vm0, %v346_v0  ;;  %253 = vst.msk [vmem:[#allocation2] sm:$0xff] %vm123_vm0, %v215_v1  ;;  %v3628_v4 = vpop.f32.mrb[2].mxu0 }
 0x151   :  { %380 = vst.msk [vmem:[#allocation2 + $0x40] sm:$0xff] %vm123_vm0, %v341_v3  ;;  %v230_v5 = vadd.f32 %v3628_v4, %v3312_v58  ;;  %v3648_v6 = vpop.f32.mrb[2].mxu1  ;;  %v224_v7 = vpop.f32.mrb[3].mxu0 }
 0x152   :  { %v356_v8 = vadd.f32 %v3648_v6, %v3321_v59  ;;  %v225_v9 = vadd.f32 %v3312_v58, %v224_v7  ;;  %v350_v10 = vpop.f32.mrb[3].mxu1 }
 0x153   :  { %256 = vst.msk [vmem:[#allocation2 + $0x18] sm:$0xff] %vm123_vm0, %v230_v5  ;;  %v351_v11 = vadd.f32 %v3321_v59, %v350_v10 }
 0x154   :  { %383 = vst.msk [vmem:[#allocation2 + $0x58] sm:$0xff] %vm123_vm0, %v356_v8  ;;  %255 = vst.msk [vmem:[#allocation2 + $0x10] sm:$0xff] %vm123_vm0, %v225_v9  ;;  %v3631_v12 = vpop.f32.mrb[4].mxu0 }
 0x155   :  { %382 = vst.msk [vmem:[#allocation2 + $0x50] sm:$0xff] %vm123_vm0, %v351_v11  ;;  %v240_v13 = vadd.f32 %v3631_v12, %v3312_v58  ;;  %v3651_v14 = vpop.f32.mrb[4].mxu1  ;;  %v234_v15 = vpop.f32.mrb[5].mxu0 }
 0x156   :  { %v366_v16 = vadd.f32 %v3651_v14, %v3321_v59  ;;  %v235_v17 = vadd.f32 %v3312_v58, %v234_v15  ;;  %v360_v18 = vpop.f32.mrb[5].mxu1 }
 0x157   :  { %258 = vst.msk [vmem:[#allocation2 + $0x28] sm:$0xff] %vm123_vm0, %v240_v13  ;;  %v361_v19 = vadd.f32 %v3321_v59, %v360_v18  ;;  %v661_v8 = vld [vmem:[#allocation2] sm:$0xff] }
 0x158   :  { %385 = vst.msk [vmem:[#allocation2 + $0x68] sm:$0xff] %vm123_vm0, %v366_v16  ;;  %257 = vst.msk [vmem:[#allocation2 + $0x20] sm:$0xff] %vm123_vm0, %v235_v17  ;;  %v3634_v20 = vpop.f32.mrb[6].mxu0  ;;  %v742_v11 = vld [vmem:[#allocation2 + $0x40] sm:$0xff] }
 0x159   :  { %384 = vst.msk [vmem:[#allocation2 + $0x60] sm:$0xff] %vm123_vm0, %v361_v19  ;;  %v250_v21 = vadd.f32 %v3634_v20, %v3312_v58  ;;  %v3654_v22 = vpop.f32.mrb[6].mxu1  ;;  %v244_v23 = vpop.f32.mrb[7].mxu0 }
 0x15a   :  { %v376_v24 = vadd.f32 %v3654_v22, %v3321_v59  ;;  %v245_v25 = vadd.f32 %v3312_v58, %v244_v23  ;;  %v370_v26 = vpop.f32.mrb[7].mxu1 }
 0x15b   :  { %260 = vst.msk [vmem:[#allocation2 + $0x38] sm:$0xff] %vm123_vm0, %v250_v21  ;;  %v371_v28 = vadd.f32 %v3321_v59, %v370_v26 }
 0x15c   :  { %387 = vst.msk [vmem:[#allocation2 + $0x78] sm:$0xff] %vm123_vm0, %v376_v24  ;;  %259 = vst.msk [vmem:[#allocation2 + $0x30] sm:$0xff] %vm123_vm0, %v245_v25  ;;  %v3665_v30 = vpop.f32.mrb[8].mxu0 }
 0x15d   :  { %386 = vst.msk [vmem:[#allocation2 + $0x70] sm:$0xff] %vm123_vm0, %v371_v28  ;;  %v473_v32 = vadd.f32 %v3665_v30, %v3330_v27  ;;  %v3685_v33 = vpop.f32.mrb[8].mxu1  ;;  %v467_v34 = vpop.f32.mrb[9].mxu0 }
 0x15e   :  { %v600_v35 = vadd.f32 %v3685_v33, %v3339_v29  ;;  %v468_v36 = vadd.f32 %v3330_v27, %v467_v34  ;;  %v594_v39 = vpop.f32.mrb[9].mxu1 }
 0x15f   :  { %508 = vst.msk [vmem:[#allocation2 + $0x88] sm:$0xff] %vm123_vm0, %v473_v32  ;;  %v595_v40 = vadd.f32 %v3339_v29, %v594_v39 }
 0x160   :  { %635 = vst.msk [vmem:[#allocation2 + $0xc8] sm:$0xff] %vm123_vm0, %v600_v35  ;;  %507 = vst.msk [vmem:[#allocation2 + $0x80] sm:$0xff] %vm123_vm0, %v468_v36  ;;  %v3668_v41 = vpop.f32.mrb[10].mxu0 }
 0x161   :  { %634 = vst.msk [vmem:[#allocation2 + $0xc0] sm:$0xff] %vm123_vm0, %v595_v40  ;;  %v483_v42 = vadd.f32 %v3668_v41, %v3330_v27  ;;  %v3688_v45 = vpop.f32.mrb[10].mxu1  ;;  %v477_v46 = vpop.f32.mrb[11].mxu0 }
 0x162   :  { %v610_v47 = vadd.f32 %v3688_v45, %v3339_v29  ;;  %v478_v48 = vadd.f32 %v3330_v27, %v477_v46  ;;  %v604_v52 = vpop.f32.mrb[11].mxu1 }
 0x163   :  { %510 = vst.msk [vmem:[#allocation2 + $0x98] sm:$0xff] %vm123_vm0, %v483_v42  ;;  %v605_v53 = vadd.f32 %v3339_v29, %v604_v52  ;;  %v1059_v52 = vld [vmem:[#allocation2 + $0x48] sm:$0xff] }
 0x164   :  { %637 = vst.msk [vmem:[#allocation2 + $0xd8] sm:$0xff] %vm123_vm0, %v610_v47  ;;  %509 = vst.msk [vmem:[#allocation2 + $0x90] sm:$0xff] %vm123_vm0, %v478_v48  ;;  %v3671_v54 = vpop.f32.mrb[12].mxu0  ;;  %v977_v47 = vld [vmem:[#allocation2 + $0x8] sm:$0xff] }
 0x165   :  { %636 = vst.msk [vmem:[#allocation2 + $0xd0] sm:$0xff] %vm123_vm0, %v605_v53  ;;  %v493_v55 = vadd.f32 %v3671_v54, %v3330_v27  ;;  %v3691_v58 = vpop.f32.mrb[12].mxu1  ;;  %v487_v59 = vpop.f32.mrb[13].mxu0 }
 0x166   :  { %v620_v60 = vadd.f32 %v3691_v58, %v3339_v29  ;;  %v488_v61 = vadd.f32 %v3330_v27, %v487_v59  ;;  %v614_v62 = vpop.f32.mrb[13].mxu1 }
 0x167   :  { %512 = vst.msk [vmem:[#allocation2 + $0xa8] sm:$0xff] %vm123_vm0, %v493_v55  ;;  %v615_v63 = vadd.f32 %v3339_v29, %v614_v62  ;;  %v820_v24 = vld [vmem:[#allocation2 + $0x80] sm:$0xff] }
 0x168   :  { %639 = vst.msk [vmem:[#allocation2 + $0xe8] sm:$0xff] %vm123_vm0, %v620_v60  ;;  %511 = vst.msk [vmem:[#allocation2 + $0xa0] sm:$0xff] %vm123_vm0, %v488_v61  ;;  %v3674_v0 = vpop.f32.mrb[14].mxu0  ;;  %v893_v19 = vld [vmem:[#allocation2 + $0xc0] sm:$0xff] }
 0x169   :  { %638 = vst.msk [vmem:[#allocation2 + $0xe0] sm:$0xff] %vm123_vm0, %v615_v63  ;;  %v503_v1 = vadd.f32 %v3674_v0, %v3330_v27  ;;  %v3694_v2 = vpop.f32.mrb[14].mxu1  ;;  %v497_v3 = vpop.f32.mrb[15].mxu0  ;;  %v1212_v63 = vld [vmem:[#allocation2 + $0xc8] sm:$0xff] }
 0x16a   :  { %v630_v4 = vadd.f32 %v3694_v2, %v3339_v29  ;;  %v498_v5 = vadd.f32 %v3330_v27, %v497_v3  ;;  %v624_v6 = vpop.f32.mrb[15].mxu1 }
 0x16b   :  { %514 = vst.msk [vmem:[#allocation2 + $0xb8] sm:$0xff] %vm123_vm0, %v503_v1  ;;  %v625_v7 = vadd.f32 %v3339_v29, %v624_v6 }
 0x16c   :  { %641 = vst.msk [vmem:[#allocation2 + $0xf8] sm:$0xff] %vm123_vm0, %v630_v4  ;;  %513 = vst.msk [vmem:[#allocation2 + $0xb0] sm:$0xff] %vm123_vm0, %v498_v5  ;;  %v731_v9 = vpop.f32.mrb[16].mxu0  ;;  %v1138_v4 = vld [vmem:[#allocation2 + $0x88] sm:$0xff] }
 0x16d   :  { %640 = vst.msk [vmem:[#allocation2 + $0xf0] sm:$0xff] %vm123_vm0, %v625_v7  ;;  %v735_v10 = vadd.f32 %v731_v9, %v661_v8  ;;  %v809_v12 = vpop.f32.mrb[16].mxu1  ;;  %v3705_v13 = vpop.f32.mrb[17].mxu0 }
 0x16e   :  { %v813_v14 = vadd.f32 %v809_v12, %v742_v11  ;;  %v3716_v15 = vpop.f32.mrb[17].mxu1 }
 0x16f   :  { %v3348_v16 = vmul.f32 -1.442695, %v735_v10 }
 0x170   :  { %v3349_v17 = vmul.f32 -1.442695, %v813_v14 }
 0x171   :  { %4302 = vpow2.f32 %v3348_v16 }
 0x172   :  { %4304 = vpow2.f32 %v3349_v17 }
 0x174   :  { %v887_v18 = vpop.f32.mrb[18].mxu0 }
 0x175   :  { %v960_v20 = vpop.f32.mrb[18].mxu1  ;;  %v3727_v21 = vpop.f32.mrb[19].mxu0  ;;  %v891_v26 = vadd.f32 %v887_v18, %v820_v24  ;;  %v1378_v24 = vld [vmem:[#allocation2 + $0x50] sm:$0xff] }
 0x176   :  { %v964_v22 = vadd.f32 %v960_v20, %v893_v19  ;;  %v3738_v23 = vpop.f32.mrb[19].mxu1 }
 0x178   :  { %v3350_v25 = vmul.f32 -1.442695, %v964_v22  ;;  %v1296_v22 = vld [vmem:[#allocation2 + $0x10] sm:$0xff] }
 0x17a   :  { %4306 = vpow2.f32 %v3350_v25 }
 0x17b   :  { %v4303_v27 = vpop.eup %4302  ;;  %4308 = vtanh.f32 %v891_v26 }
 0x17c   :  { %v4305_v28 = vpop.eup %4304  ;;  %v739_v29 = vadd.f32 1.0, %v4303_v27 }
 0x17d   :  { %v817_v30 = vadd.f32 1.0, %v4305_v28 }
 0x17e   :  { %4310 = vrcp.f32 %v739_v29 }
 0x17f   :  { %4312 = vrcp.f32 %v817_v30 }
 0x184   :  { %v4307_v32 = vpop.eup %4306 }
 0x185   :  { %v4309_v33 = vpop.eup %4308  ;;  %v968_v39 = vadd.f32 1.0, %v4307_v32 }
 0x187   :  { %4314 = vrcp.f32 %v968_v39 }
 0x188   :  { %v4311_v34 = vpop.eup %4310 }
 0x189   :  { %v4313_v35 = vpop.eup %4312  ;;  %v972_v36 = vmul.f32 %v4311_v34, %v4309_v33  ;;  %v1531_v34 = vld [vmem:[#allocation2 + $0xd0] sm:$0xff] }
 0x18a   :  { %v971_v40 = vmul.f32 0.0, %v4313_v35 }
 0x18c   :  { %v4863_v41 = vadd.f32 %v972_v36, %v971_v40 }
 0x18e   :  { %4316 = vtanh.f32 %v4863_v41 }
 0x191   :  { %v4315_v42 = vpop.eup %4314 }
 0x198   :  { %v4317_v45 = vpop.eup %4316 }
 0x199   :  { %v975_v46 = vmul.f32 %v4317_v45, %v4315_v42 }
 0x19b   :  { %3748 = vmatmul.mubr.msk.f32.vlgmr.msra.gmra.mrb[20].mxu0 %vm123_vm0, %v975_v46  ;;  %3759 = vmatmul.mubr.msk.f32.vlgmr.msra.gmra.mrb[20].mxu1 %vm123_vm0, %v975_v46 }
 0x19c   :  { %4128 = vmatpush3.bf16.msra.mxu0 %v4793_v50  ;;  %4134 = vmatpush3.bf16.msra.mxu1 %v4797_v51 }
 0x19d   :  { %4129 = vmatprep.subr.bf16.mxu0 %v4604_v31  ;;  %4135 = vmatprep.subr.bf16.mxu1 %v4604_v31 }
 0x19e   :  { %3769 = vmatprep.mubr.msk.f32.mxu0 %vm4605_vm1, %v4606_v49  ;;  %3780 = vmatprep.mubr.msk.f32.mxu1 %vm4605_vm1, %v4606_v49 }
 0x1a0   :  { %4131 = vmatpush3.bf16.msra.mxu0 %v4802_v56  ;;  %4137 = vmatpush3.bf16.msra.mxu1 %v4806_v57 }
 0x1a1   :  { %4138 = vmatprep.subr.bf16.mxu0 %v4604_v31  ;;  %4144 = vmatprep.subr.bf16.mxu1 %v4604_v31 }
 0x1a3   :  { %3770 = vmatmul.mubr.msk.f32.vlgmr.msra.gmra.mrb[22].mxu0 %vm123_vm0, %v975_v46  ;;  %3781 = vmatmul.mubr.msk.f32.vlgmr.msra.gmra.mrb[22].mxu1 %vm123_vm0, %v975_v46 }
 0x1a4   :  { %4140 = vmatpush3.bf16.msra.mxu0 %v4760_v37  ;;  %4146 = vmatpush3.bf16.msra.mxu1 %v4763_v38 }
 0x1a5   :  { %4141 = vmatprep.subr.bf16.mxu0 %v4604_v31  ;;  %4147 = vmatprep.subr.bf16.mxu1 %v4604_v31 }
 0x1a6   :  { %3791 = vmatprep.mubr.msk.f32.mxu0 %vm4605_vm1, %v4606_v49  ;;  %3802 = vmatprep.mubr.msk.f32.mxu1 %vm4605_vm1, %v4606_v49 }
 0x1a8   :  { %4143 = vmatpush3.bf16.msra.mxu0 %v4770_v43  ;;  %4149 = vmatpush3.bf16.msra.mxu1 %v4774_v44 }
 0x1a9   :  { %4150 = vmatprep.subr.bf16.mxu0 %v4604_v31  ;;  %4156 = vmatprep.subr.bf16.mxu1 %v4604_v31 }
 0x26e   :  { %v1047_v48 = vpop.f32.mrb[20].mxu0  ;;  %v1126_v53 = vpop.f32.mrb[20].mxu1 }
 0x26f   :  { %v1051_v54 = vadd.f32 %v1047_v48, %v977_v47  ;;  %v1130_v55 = vadd.f32 %v1126_v53, %v1059_v52  ;;  %v3749_v58 = vpop.f32.mrb[21].mxu0  ;;  %v3760_v59 = vpop.f32.mrb[21].mxu1 }
 0x271   :  { %v3352_v60 = vmul.f32 -1.442695, %v1051_v54  ;;  %v3354_v61 = vmul.f32 -1.442695, %v1130_v55 }
 0x273   :  { %4318 = vpow2.f32 %v3352_v60 }
 0x274   :  { %4320 = vpow2.f32 %v3354_v61 }
 0x276   :  { %v1205_v62 = vpop.f32.mrb[22].mxu0  ;;  %v1279_v0 = vpop.f32.mrb[22].mxu1 }
 0x277   :  { %v1283_v1 = vadd.f32 %v1279_v0, %v1212_v63  ;;  %v3771_v2 = vpop.f32.mrb[23].mxu0  ;;  %v3782_v3 = vpop.f32.mrb[23].mxu1  ;;  %v1209_v6 = vadd.f32 %v1205_v62, %v1138_v4  ;;  %v1697_v4 = vld [vmem:[#allocation2 + $0x58] sm:$0xff] }
 0x278   :  { %v1615_v2 = vld [vmem:[#allocation2 + $0x18] sm:$0xff] }
 0x279   :  { %v3357_v5 = vmul.f32 -1.442695, %v1283_v1 }
 0x27b   :  { %4322 = vpow2.f32 %v3357_v5 }
 0x27c   :  { %4324 = vtanh.f32 %v1209_v6 }
 0x27d   :  { %v4319_v7 = vpop.eup %4318 }
 0x27e   :  { %v4321_v8 = vpop.eup %4320  ;;  %v1055_v9 = vadd.f32 1.0, %v4319_v7 }
 0x27f   :  { %v1134_v10 = vadd.f32 1.0, %v4321_v8 }
 0x280   :  { %4326 = vrcp.f32 %v1055_v9 }
 0x281   :  { %4328 = vrcp.f32 %v1134_v10 }
 0x285   :  { %v4323_v11 = vpop.eup %4322 }
 0x286   :  { %v4325_v12 = vpop.eup %4324  ;;  %v1287_v16 = vadd.f32 1.0, %v4323_v11 }
 0x288   :  { %4330 = vrcp.f32 %v1287_v16 }
 0x28a   :  { %v4327_v13 = vpop.eup %4326 }
 0x28b   :  { %v4329_v14 = vpop.eup %4328  ;;  %v1291_v15 = vmul.f32 %v4327_v13, %v4325_v12  ;;  %v1850_v13 = vld [vmem:[#allocation2 + $0xd8] sm:$0xff] }
 0x28c   :  { %v1290_v17 = vmul.f32 %v4329_v14, %v4863_v41  ;;  %v1457_v41 = vld [vmem:[#allocation2 + $0x90] sm:$0xff] }
 0x28e   :  { %v4895_v18 = vadd.f32 %v1291_v15, %v1290_v17 }
 0x290   :  { %4332 = vtanh.f32 %v4895_v18 }
 0x292   :  { %v4331_v19 = vpop.eup %4330 }
 0x29a   :  { %v4333_v20 = vpop.eup %4332 }
 0x29b   :  { %v1294_v21 = vmul.f32 %v4333_v20, %v4331_v19 }
 0x29d   :  { %3792 = vmatmul.mubr.msk.f32.vlgmr.msra.gmra.mrb[24].mxu0 %vm123_vm0, %v1294_v21  ;;  %3803 = vmatmul.mubr.msk.f32.vlgmr.msra.gmra.mrb[24].mxu1 %vm123_vm0, %v1294_v21 }
 0x29e   :  { %4152 = vmatpush3.bf16.msra.mxu0 %v4793_v50  ;;  %4158 = vmatpush3.bf16.msra.mxu1 %v4797_v51 }
 0x29f   :  { %4153 = vmatprep.subr.bf16.mxu0 %v4604_v31  ;;  %4159 = vmatprep.subr.bf16.mxu1 %v4604_v31 }
 0x2a0   :  { %3813 = vmatprep.mubr.msk.f32.mxu0 %vm4605_vm1, %v4606_v49  ;;  %3824 = vmatprep.mubr.msk.f32.mxu1 %vm4605_vm1, %v4606_v49 }
 0x2a2   :  { %4155 = vmatpush3.bf16.msra.mxu0 %v4802_v56  ;;  %4161 = vmatpush3.bf16.msra.mxu1 %v4806_v57 }
 0x2a3   :  { %4162 = vmatprep.subr.bf16.mxu0 %v4604_v31  ;;  %4168 = vmatprep.subr.bf16.mxu1 %v4604_v31 }
 0x2a5   :  { %3814 = vmatmul.mubr.msk.f32.vlgmr.msra.gmra.mrb[26].mxu0 %vm123_vm0, %v1294_v21  ;;  %3825 = vmatmul.mubr.msk.f32.vlgmr.msra.gmra.mrb[26].mxu1 %vm123_vm0, %v1294_v21 }
 0x2a6   :  { %4164 = vmatpush3.bf16.msra.mxu0 %v4760_v37  ;;  %4170 = vmatpush3.bf16.msra.mxu1 %v4763_v38 }
 0x2a7   :  { %4165 = vmatprep.subr.bf16.mxu0 %v4604_v31  ;;  %4171 = vmatprep.subr.bf16.mxu1 %v4604_v31 }
 0x2a8   :  { %3835 = vmatprep.mubr.msk.f32.mxu0 %vm4605_vm1, %v4606_v49  ;;  %3846 = vmatprep.mubr.msk.f32.mxu1 %vm4605_vm1, %v4606_v49 }
 0x2aa   :  { %4167 = vmatpush3.bf16.msra.mxu0 %v4770_v43  ;;  %4173 = vmatpush3.bf16.msra.mxu1 %v4774_v44 }
 0x2ab   :  { %4174 = vmatprep.subr.bf16.mxu0 %v4604_v31  ;;  %4180 = vmatprep.subr.bf16.mxu1 %v4604_v31 }
 0x370   :  { %v1366_v23 = vpop.f32.mrb[24].mxu0  ;;  %v1445_v25 = vpop.f32.mrb[24].mxu1 }
 0x371   :  { %v1370_v26 = vadd.f32 %v1366_v23, %v1296_v22  ;;  %v1449_v27 = vadd.f32 %v1445_v25, %v1378_v24  ;;  %v3793_v28 = vpop.f32.mrb[25].mxu0  ;;  %v3804_v29 = vpop.f32.mrb[25].mxu1 }
 0x373   :  { %v3359_v30 = vmul.f32 -1.442695, %v1370_v26  ;;  %v3361_v32 = vmul.f32 -1.442695, %v1449_v27 }
 0x375   :  { %4334 = vpow2.f32 %v3359_v30 }
 0x376   :  { %4336 = vpow2.f32 %v3361_v32 }
 0x378   :  { %v1524_v33 = vpop.f32.mrb[26].mxu0  ;;  %v1598_v35 = vpop.f32.mrb[26].mxu1 }
 0x379   :  { %v1602_v36 = vadd.f32 %v1598_v35, %v1531_v34  ;;  %v3815_v39 = vpop.f32.mrb[27].mxu0  ;;  %v3826_v40 = vpop.f32.mrb[27].mxu1  ;;  %v1528_v45 = vadd.f32 %v1524_v33, %v1457_v41  ;;  %v2016_v41 = vld [vmem:[#allocation2 + $0x60] sm:$0xff] }
 0x37a   :  { %v1934_v39 = vld [vmem:[#allocation2 + $0x20] sm:$0xff] }
 0x37b   :  { %v3364_v42 = vmul.f32 -1.442695, %v1602_v36 }
 0x37d   :  { %4338 = vpow2.f32 %v3364_v42 }
 0x37e   :  { %4340 = vtanh.f32 %v1528_v45 }
 0x37f   :  { %v4335_v46 = vpop.eup %4334 }
 0x380   :  { %v4337_v47 = vpop.eup %4336  ;;  %v1374_v48 = vadd.f32 1.0, %v4335_v46 }
 0x381   :  { %v1453_v52 = vadd.f32 1.0, %v4337_v47 }
 0x382   :  { %4342 = vrcp.f32 %v1374_v48 }
 0x383   :  { %4344 = vrcp.f32 %v1453_v52 }
 0x387   :  { %v4339_v53 = vpop.eup %4338 }
 0x388   :  { %v4341_v54 = vpop.eup %4340  ;;  %v1606_v60 = vadd.f32 1.0, %v4339_v53 }
 0x38a   :  { %4346 = vrcp.f32 %v1606_v60 }
 0x38c   :  { %v4343_v55 = vpop.eup %4342 }
 0x38d   :  { %v4345_v58 = vpop.eup %4344  ;;  %v1610_v59 = vmul.f32 %v4343_v55, %v4341_v54  ;;  %v2169_v55 = vld [vmem:[#allocation2 + $0xe0] sm:$0xff] }
 0x38e   :  { %v1609_v61 = vmul.f32 %v4345_v58, %v4895_v18  ;;  %v1776_v18 = vld [vmem:[#allocation2 + $0x98] sm:$0xff] }
 0x390   :  { %v4927_v62 = vadd.f32 %v1610_v59, %v1609_v61 }
 0x392   :  { %4348 = vtanh.f32 %v4927_v62 }
 0x394   :  { %v4347_v63 = vpop.eup %4346 }
 0x39c   :  { %v4349_v0 = vpop.eup %4348 }
 0x39d   :  { %v1613_v1 = vmul.f32 %v4349_v0, %v4347_v63 }
 0x39f   :  { %3836 = vmatmul.mubr.msk.f32.vlgmr.msra.gmra.mrb[28].mxu0 %vm123_vm0, %v1613_v1  ;;  %3847 = vmatmul.mubr.msk.f32.vlgmr.msra.gmra.mrb[28].mxu1 %vm123_vm0, %v1613_v1 }
 0x3a0   :  { %4176 = vmatpush3.bf16.msra.mxu0 %v4793_v50  ;;  %4182 = vmatpush3.bf16.msra.mxu1 %v4797_v51 }
 0x3a1   :  { %4177 = vmatprep.subr.bf16.mxu0 %v4604_v31  ;;  %4183 = vmatprep.subr.bf16.mxu1 %v4604_v31 }
 0x3a2   :  { %3857 = vmatprep.mubr.msk.f32.mxu0 %vm4605_vm1, %v4606_v49  ;;  %3868 = vmatprep.mubr.msk.f32.mxu1 %vm4605_vm1, %v4606_v49 }
 0x3a4   :  { %4179 = vmatpush3.bf16.msra.mxu0 %v4802_v56  ;;  %4185 = vmatpush3.bf16.msra.mxu1 %v4806_v57 }
 0x3a5   :  { %4186 = vmatprep.subr.bf16.mxu0 %v4604_v31  ;;  %4192 = vmatprep.subr.bf16.mxu1 %v4604_v31 }
 0x3a7   :  { %3858 = vmatmul.mubr.msk.f32.vlgmr.msra.gmra.mrb[30].mxu0 %vm123_vm0, %v1613_v1  ;;  %3869 = vmatmul.mubr.msk.f32.vlgmr.msra.gmra.mrb[30].mxu1 %vm123_vm0, %v1613_v1 }
 0x3a8   :  { %4188 = vmatpush3.bf16.msra.mxu0 %v4760_v37  ;;  %4194 = vmatpush3.bf16.msra.mxu1 %v4763_v38 }
 0x3a9   :  { %4189 = vmatprep.subr.bf16.mxu0 %v4604_v31  ;;  %4195 = vmatprep.subr.bf16.mxu1 %v4604_v31 }
 0x3aa   :  { %3879 = vmatprep.mubr.msk.f32.mxu0 %vm4605_vm1, %v4606_v49  ;;  %3890 = vmatprep.mubr.msk.f32.mxu1 %vm4605_vm1, %v4606_v49 }
 0x3ac   :  { %4191 = vmatpush3.bf16.msra.mxu0 %v4770_v43  ;;  %4197 = vmatpush3.bf16.msra.mxu1 %v4774_v44 }
 0x3ad   :  { %4198 = vmatprep.subr.bf16.mxu0 %v4604_v31  ;;  %4204 = vmatprep.subr.bf16.mxu1 %v4604_v31 }
 0x472   :  { %v1685_v3 = vpop.f32.mrb[28].mxu0  ;;  %v1764_v5 = vpop.f32.mrb[28].mxu1 }
 0x473   :  { %v1689_v6 = vadd.f32 %v1685_v3, %v1615_v2  ;;  %v1768_v7 = vadd.f32 %v1764_v5, %v1697_v4  ;;  %v3837_v8 = vpop.f32.mrb[29].mxu0  ;;  %v3848_v9 = vpop.f32.mrb[29].mxu1 }
 0x475   :  { %v3366_v10 = vmul.f32 -1.442695, %v1689_v6  ;;  %v3368_v11 = vmul.f32 -1.442695, %v1768_v7 }
 0x477   :  { %4350 = vpow2.f32 %v3366_v10 }
 0x478   :  { %4352 = vpow2.f32 %v3368_v11 }
 0x47a   :  { %v1843_v12 = vpop.f32.mrb[30].mxu0  ;;  %v1917_v14 = vpop.f32.mrb[30].mxu1 }
 0x47b   :  { %v1921_v15 = vadd.f32 %v1917_v14, %v1850_v13  ;;  %v3859_v16 = vpop.f32.mrb[31].mxu0  ;;  %v3870_v17 = vpop.f32.mrb[31].mxu1  ;;  %v1847_v20 = vadd.f32 %v1843_v12, %v1776_v18  ;;  %v2335_v18 = vld [vmem:[#allocation2 + $0x68] sm:$0xff] }
 0x47c   :  { %v2253_v16 = vld [vmem:[#allocation2 + $0x28] sm:$0xff] }
 0x47d   :  { %v3371_v19 = vmul.f32 -1.442695, %v1921_v15 }
 0x47f   :  { %4354 = vpow2.f32 %v3371_v19 }
 0x480   :  { %4356 = vtanh.f32 %v1847_v20 }
 0x481   :  { %v4351_v21 = vpop.eup %4350 }
 0x482   :  { %v4353_v22 = vpop.eup %4352  ;;  %v1693_v23 = vadd.f32 1.0, %v4351_v21 }
 0x483   :  { %v1772_v24 = vadd.f32 1.0, %v4353_v22 }
 0x484   :  { %4358 = vrcp.f32 %v1693_v23 }
 0x485   :  { %4360 = vrcp.f32 %v1772_v24 }
 0x489   :  { %v4355_v25 = vpop.eup %4354 }
 0x48a   :  { %v4357_v26 = vpop.eup %4356  ;;  %v1925_v30 = vadd.f32 1.0, %v4355_v25 }
 0x48c   :  { %4362 = vrcp.f32 %v1925_v30 }
 0x48e   :  { %v4359_v27 = vpop.eup %4358 }
 0x48f   :  { %v4361_v28 = vpop.eup %4360  ;;  %v1929_v29 = vmul.f32 %v4359_v27, %v4357_v26  ;;  %v2488_v27 = vld [vmem:[#allocation2 + $0xe8] sm:$0xff] }
 0x490   :  { %v1928_v32 = vmul.f32 %v4361_v28, %v4927_v62  ;;  %v2095_v62 = vld [vmem:[#allocation2 + $0xa0] sm:$0xff] }
 0x492   :  { %v4959_v33 = vadd.f32 %v1929_v29, %v1928_v32 }
 0x494   :  { %4364 = vtanh.f32 %v4959_v33 }
 0x496   :  { %v4363_v34 = vpop.eup %4362 }
 0x49e   :  { %v4365_v35 = vpop.eup %4364 }
 0x49f   :  { %v1932_v36 = vmul.f32 %v4365_v35, %v4363_v34 }
 0x4a1   :  { %3880 = vmatmul.mubr.msk.f32.vlgmr.msra.gmra.mrb[32].mxu0 %vm123_vm0, %v1932_v36  ;;  %3891 = vmatmul.mubr.msk.f32.vlgmr.msra.gmra.mrb[32].mxu1 %vm123_vm0, %v1932_v36 }
 0x4a2   :  { %4200 = vmatpush3.bf16.msra.mxu0 %v4793_v50  ;;  %4206 = vmatpush3.bf16.msra.mxu1 %v4797_v51 }
 0x4a3   :  { %4201 = vmatprep.subr.bf16.mxu0 %v4604_v31  ;;  %4207 = vmatprep.subr.bf16.mxu1 %v4604_v31 }
 0x4a4   :  { %3901 = vmatprep.mubr.msk.f32.mxu0 %vm4605_vm1, %v4606_v49  ;;  %3912 = vmatprep.mubr.msk.f32.mxu1 %vm4605_vm1, %v4606_v49 }
 0x4a6   :  { %4203 = vmatpush3.bf16.msra.mxu0 %v4802_v56  ;;  %4209 = vmatpush3.bf16.msra.mxu1 %v4806_v57 }
 0x4a7   :  { %4210 = vmatprep.subr.bf16.mxu0 %v4604_v31  ;;  %4216 = vmatprep.subr.bf16.mxu1 %v4604_v31 }
 0x4a9   :  { %3902 = vmatmul.mubr.msk.f32.vlgmr.msra.gmra.mrb[34].mxu0 %vm123_vm0, %v1932_v36  ;;  %3913 = vmatmul.mubr.msk.f32.vlgmr.msra.gmra.mrb[34].mxu1 %vm123_vm0, %v1932_v36 }
 0x4aa   :  { %4212 = vmatpush3.bf16.msra.mxu0 %v4760_v37  ;;  %4218 = vmatpush3.bf16.msra.mxu1 %v4763_v38 }
 0x4ab   :  { %4213 = vmatprep.subr.bf16.mxu0 %v4604_v31  ;;  %4219 = vmatprep.subr.bf16.mxu1 %v4604_v31 }
 0x4ac   :  { %3923 = vmatprep.mubr.msk.f32.mxu0 %vm4605_vm1, %v4606_v49  ;;  %3934 = vmatprep.mubr.msk.f32.mxu1 %vm4605_vm1, %v4606_v49 }
 0x4ae   :  { %4215 = vmatpush3.bf16.msra.mxu0 %v4770_v43  ;;  %4221 = vmatpush3.bf16.msra.mxu1 %v4774_v44 }
 0x4af   :  { %4222 = vmatprep.subr.bf16.mxu0 %v4604_v31  ;;  %4228 = vmatprep.subr.bf16.mxu1 %v4604_v31 }
 0x574   :  { %v2004_v40 = vpop.f32.mrb[32].mxu0  ;;  %v2083_v42 = vpop.f32.mrb[32].mxu1 }
 0x575   :  { %v2008_v45 = vadd.f32 %v2004_v40, %v1934_v39  ;;  %v2087_v46 = vadd.f32 %v2083_v42, %v2016_v41  ;;  %v3881_v47 = vpop.f32.mrb[33].mxu0  ;;  %v3892_v48 = vpop.f32.mrb[33].mxu1 }
 0x577   :  { %v3373_v52 = vmul.f32 -1.442695, %v2008_v45  ;;  %v3375_v53 = vmul.f32 -1.442695, %v2087_v46 }
 0x579   :  { %4366 = vpow2.f32 %v3373_v52 }
 0x57a   :  { %4368 = vpow2.f32 %v3375_v53 }
 0x57c   :  { %v2162_v54 = vpop.f32.mrb[34].mxu0  ;;  %v2236_v58 = vpop.f32.mrb[34].mxu1 }
 0x57d   :  { %v2240_v59 = vadd.f32 %v2236_v58, %v2169_v55  ;;  %v3903_v60 = vpop.f32.mrb[35].mxu0  ;;  %v3914_v61 = vpop.f32.mrb[35].mxu1  ;;  %v2166_v0 = vadd.f32 %v2162_v54, %v2095_v62 }
 0x57e   :  { %v2654_v60 = vld [vmem:[#allocation2 + $0x70] sm:$0xff] }
 0x57f   :  { %v3378_v63 = vmul.f32 -1.442695, %v2240_v59 }
 0x581   :  { %4370 = vpow2.f32 %v3378_v63 }
 0x582   :  { %4372 = vtanh.f32 %v2166_v0 }
 0x583   :  { %v4367_v1 = vpop.eup %4366 }
 0x584   :  { %v4369_v2 = vpop.eup %4368  ;;  %v2012_v3 = vadd.f32 1.0, %v4367_v1 }
 0x585   :  { %v2091_v4 = vadd.f32 1.0, %v4369_v2 }
 0x586   :  { %4374 = vrcp.f32 %v2012_v3 }
 0x587   :  { %4376 = vrcp.f32 %v2091_v4 }
 0x58b   :  { %v4371_v5 = vpop.eup %4370 }
 0x58c   :  { %v4373_v6 = vpop.eup %4372  ;;  %v2244_v10 = vadd.f32 1.0, %v4371_v5 }
 0x58e   :  { %4378 = vrcp.f32 %v2244_v10 }
 0x590   :  { %v4375_v7 = vpop.eup %4374 }
 0x591   :  { %v4377_v8 = vpop.eup %4376  ;;  %v2248_v9 = vmul.f32 %v4375_v7, %v4373_v6 }
 0x592   :  { %v2247_v11 = vmul.f32 %v4377_v8, %v4959_v33  ;;  %v2414_v33 = vld [vmem:[#allocation2 + $0xa8] sm:$0xff]  ;;  %v2733_v8 = vld [vmem:[#allocation2 + $0xb0] sm:$0xff] }
 0x594   :  { %v4991_v12 = vadd.f32 %v2248_v9, %v2247_v11 }
 0x596   :  { %4380 = vtanh.f32 %v4991_v12 }
 0x598   :  { %v4379_v13 = vpop.eup %4378 }
 0x5a0   :  { %v4381_v14 = vpop.eup %4380 }
 0x5a1   :  { %v2251_v15 = vmul.f32 %v4381_v14, %v4379_v13 }
 0x5a3   :  { %3924 = vmatmul.mubr.msk.f32.vlgmr.msra.gmra.mrb[36].mxu0 %vm123_vm0, %v2251_v15  ;;  %3935 = vmatmul.mubr.msk.f32.vlgmr.msra.gmra.mrb[36].mxu1 %vm123_vm0, %v2251_v15 }
 0x5a4   :  { %4224 = vmatpush3.bf16.msra.mxu0 %v4793_v50  ;;  %4230 = vmatpush3.bf16.msra.mxu1 %v4797_v51 }
 0x5a5   :  { %4225 = vmatprep.subr.bf16.mxu0 %v4604_v31  ;;  %4231 = vmatprep.subr.bf16.mxu1 %v4604_v31 }
 0x5a6   :  { %3945 = vmatprep.mubr.msk.f32.mxu0 %vm4605_vm1, %v4606_v49  ;;  %3956 = vmatprep.mubr.msk.f32.mxu1 %vm4605_vm1, %v4606_v49 }
 0x5a8   :  { %4227 = vmatpush3.bf16.msra.mxu0 %v4802_v56  ;;  %4233 = vmatpush3.bf16.msra.mxu1 %v4806_v57 }
 0x5a9   :  { %4234 = vmatprep.subr.bf16.mxu0 %v4604_v31  ;;  %4240 = vmatprep.subr.bf16.mxu1 %v4604_v31 }
 0x5ab   :  { %3946 = vmatmul.mubr.msk.f32.vlgmr.msra.gmra.mrb[38].mxu0 %vm123_vm0, %v2251_v15  ;;  %3957 = vmatmul.mubr.msk.f32.vlgmr.msra.gmra.mrb[38].mxu1 %vm123_vm0, %v2251_v15 }
 0x5ac   :  { %4236 = vmatpush3.bf16.msra.mxu0 %v4760_v37  ;;  %4242 = vmatpush3.bf16.msra.mxu1 %v4763_v38 }
 0x5ad   :  { %4237 = vmatprep.subr.bf16.mxu0 %v4604_v31  ;;  %4243 = vmatprep.subr.bf16.mxu1 %v4604_v31 }
 0x5ae   :  { %3967 = vmatprep.mubr.msk.f32.mxu0 %vm4605_vm1, %v4606_v49  ;;  %3978 = vmatprep.mubr.msk.f32.mxu1 %vm4605_vm1, %v4606_v49 }
 0x5b0   :  { %4239 = vmatpush3.bf16.msra.mxu0 %v4770_v43  ;;  %4245 = vmatpush3.bf16.msra.mxu1 %v4774_v44 }
 0x5b1   :  { %4246 = vmatprep.subr.bf16.mxu0 %v4604_v31  ;;  %4252 = vmatprep.subr.bf16.mxu1 %v4604_v31 }
 0x676   :  { %v2323_v17 = vpop.f32.mrb[36].mxu0  ;;  %v2402_v19 = vpop.f32.mrb[36].mxu1 }
 0x677   :  { %v2327_v20 = vadd.f32 %v2323_v17, %v2253_v16  ;;  %v2406_v21 = vadd.f32 %v2402_v19, %v2335_v18  ;;  %v3925_v22 = vpop.f32.mrb[37].mxu0  ;;  %v3936_v23 = vpop.f32.mrb[37].mxu1 }
 0x679   :  { %v3380_v24 = vmul.f32 -1.442695, %v2327_v20  ;;  %v3382_v25 = vmul.f32 -1.442695, %v2406_v21 }
 0x67b   :  { %4382 = vpow2.f32 %v3380_v24 }
 0x67c   :  { %4384 = vpow2.f32 %v3382_v25 }
 0x67e   :  { %v2481_v26 = vpop.f32.mrb[38].mxu0  ;;  %v2555_v28 = vpop.f32.mrb[38].mxu1 }
 0x67f   :  { %v2559_v29 = vadd.f32 %v2555_v28, %v2488_v27  ;;  %v3947_v30 = vpop.f32.mrb[39].mxu0  ;;  %v3958_v32 = vpop.f32.mrb[39].mxu1  ;;  %v2485_v35 = vadd.f32 %v2481_v26, %v2414_v33  ;;  %v3211_v26 = vld [vmem:[#allocation11 + $0x10] sm:$0xff]  ;;  %v3212_v28 = vld [vmem:[#allocation11 + $0x18] sm:$0xff] }
 0x680   :  { %v2973_v30 = vld [vmem:[#allocation2 + $0x78] sm:$0xff] }
 0x681   :  { %v3385_v34 = vmul.f32 -1.442695, %v2559_v29  ;;  %v4286_v29 = vpack.c.bf16 %v3212_v28, %v3211_v26 }
 0x683   :  { %4386 = vpow2.f32 %v3385_v34 }
 0x684   :  { %4388 = vtanh.f32 %v2485_v35 }
 0x685   :  { %v4383_v36 = vpop.eup %4382 }
 0x686   :  { %v4385_v39 = vpop.eup %4384  ;;  %v2331_v40 = vadd.f32 1.0, %v4383_v36 }
 0x687   :  { %v2410_v41 = vadd.f32 1.0, %v4385_v39 }
 0x688   :  { %4390 = vrcp.f32 %v2331_v40 }
 0x689   :  { %4392 = vrcp.f32 %v2410_v41  ;;  %v3126_v41 = vld [vmem:[#allocation2 + $0xf8] sm:$0xff] }
 0x68d   :  { %v4387_v42 = vpop.eup %4386 }
 0x68e   :  { %v4389_v45 = vpop.eup %4388  ;;  %v2563_v52 = vadd.f32 1.0, %v4387_v42 }
 0x690   :  { %4394 = vrcp.f32 %v2563_v52 }
 0x692   :  { %v4391_v46 = vpop.eup %4390 }
 0x693   :  { %v4393_v47 = vpop.eup %4392  ;;  %v2567_v48 = vmul.f32 %v4391_v46, %v4389_v45 }
 0x694   :  { %v2566_v53 = vmul.f32 %v4393_v47, %v4991_v12 }
 0x696   :  { %v5023_v54 = vadd.f32 %v2567_v48, %v2566_v53 }
 0x698   :  { %4396 = vtanh.f32 %v5023_v54 }
 0x69a   :  { %v4395_v55 = vpop.eup %4394 }
 0x6a2   :  { %v4397_v58 = vpop.eup %4396 }
 0x6a3   :  { %v2570_v59 = vmul.f32 %v4397_v58, %v4395_v55 }
 0x6a5   :  { %3968 = vmatmul.mubr.msk.f32.vlgmr.msra.gmra.mrb[40].mxu0 %vm123_vm0, %v2570_v59  ;;  %3979 = vmatmul.mubr.msk.f32.vlgmr.msra.gmra.mrb[40].mxu1 %vm123_vm0, %v2570_v59 }
 0x6a6   :  { %4248 = vmatpush3.bf16.msra.mxu0 %v4793_v50  ;;  %4254 = vmatpush3.bf16.msra.mxu1 %v4797_v51 }
 0x6a7   :  { %4249 = vmatprep.subr.bf16.mxu0 %v4604_v31  ;;  %4255 = vmatprep.subr.bf16.mxu1 %v4604_v31 }
 0x6a8   :  { %3989 = vmatprep.mubr.msk.f32.mxu0 %vm4605_vm1, %v4606_v49  ;;  %4000 = vmatprep.mubr.msk.f32.mxu1 %vm4605_vm1, %v4606_v49 }
 0x6aa   :  { %4251 = vmatpush3.bf16.msra.mxu0 %v4802_v56  ;;  %4257 = vmatpush3.bf16.msra.mxu1 %v4806_v57 }
 0x6ab   :  { %4258 = vmatprep.subr.bf16.mxu0 %v4604_v31  ;;  %4264 = vmatprep.subr.bf16.mxu1 %v4604_v31 }
 0x6ad   :  { %3990 = vmatmul.mubr.msk.f32.vlgmr.msra.gmra.mrb[42].mxu0 %vm123_vm0, %v2570_v59  ;;  %4001 = vmatmul.mubr.msk.f32.vlgmr.msra.gmra.mrb[42].mxu1 %vm123_vm0, %v2570_v59 }
 0x6ae   :  { %4260 = vmatpush3.bf16.msra.mxu0 %v4760_v37  ;;  %4266 = vmatpush3.bf16.msra.mxu1 %v4763_v38  ;;  %v2572_v37 = vld [vmem:[#allocation2 + $0x30] sm:$0xff] }
 0x6af   :  { %4261 = vmatprep.subr.bf16.mxu0 %v4604_v31  ;;  %4267 = vmatprep.subr.bf16.mxu1 %v4604_v31 }
 0x6b0   :  { %4011 = vmatprep.mubr.msk.f32.mxu0 %vm4605_vm1, %v4606_v49  ;;  %4022 = vmatprep.mubr.msk.f32.mxu1 %vm4605_vm1, %v4606_v49 }
 0x6b2   :  { %4263 = vmatpush3.bf16.msra.mxu0 %v4770_v43  ;;  %4269 = vmatpush3.bf16.msra.mxu1 %v4774_v44  ;;  %v2807_v43 = vld [vmem:[#allocation2 + $0xf0] sm:$0xff] }
 0x6b3   :  { %4270 = vmatprep.subr.bf16.mxu0 %v4604_v31  ;;  %4276 = vmatprep.subr.bf16.mxu1 %v4604_v31 }
 0x778   :  { %v2642_v38 = vpop.f32.mrb[40].mxu0  ;;  %v2721_v61 = vpop.f32.mrb[40].mxu1 }
 0x779   :  { %v2646_v62 = vadd.f32 %v2642_v38, %v2572_v37  ;;  %v2725_v63 = vadd.f32 %v2721_v61, %v2654_v60  ;;  %v3969_v0 = vpop.f32.mrb[41].mxu0  ;;  %v3980_v1 = vpop.f32.mrb[41].mxu1 }
 0x77b   :  { %v3387_v2 = vmul.f32 -1.442695, %v2646_v62  ;;  %v3389_v3 = vmul.f32 -1.442695, %v2725_v63 }
 0x77d   :  { %4398 = vpow2.f32 %v3387_v2 }
 0x77e   :  { %4400 = vpow2.f32 %v3389_v3 }
 0x780   :  { %v2800_v4 = vpop.f32.mrb[42].mxu0  ;;  %v2874_v5 = vpop.f32.mrb[42].mxu1 }
 0x781   :  { %v2878_v44 = vadd.f32 %v2874_v5, %v2807_v43  ;;  %v3991_v6 = vpop.f32.mrb[43].mxu0  ;;  %v4002_v7 = vpop.f32.mrb[43].mxu1  ;;  %v2804_v10 = vadd.f32 %v2800_v4, %v2733_v8  ;;  %v3400_v4 = vld [vmem:[#allocation12] ss:$0 sm:$0xff] }
 0x783   :  { %v3392_v9 = vmul.f32 -1.442695, %v2878_v44 }
 0x785   :  { %4402 = vpow2.f32 %v3392_v9 }
 0x786   :  { %4404 = vtanh.f32 %v2804_v10 }
 0x787   :  { %v4399_v11 = vpop.eup %4398 }
 0x788   :  { %v4401_v12 = vpop.eup %4400  ;;  %v2650_v13 = vadd.f32 1.0, %v4399_v11 }
 0x789   :  { %v2729_v14 = vadd.f32 1.0, %v4401_v12 }
 0x78a   :  { %4406 = vrcp.f32 %v2650_v13 }
 0x78b   :  { %4408 = vrcp.f32 %v2729_v14 }
 0x78f   :  { %v4403_v15 = vpop.eup %4402 }
 0x790   :  { %v4405_v16 = vpop.eup %4404  ;;  %v2882_v20 = vadd.f32 1.0, %v4403_v15 }
 0x792   :  { %4410 = vrcp.f32 %v2882_v20 }
 0x794   :  { %v4407_v17 = vpop.eup %4406 }
 0x795   :  { %v4409_v18 = vpop.eup %4408  ;;  %v2886_v19 = vmul.f32 %v4407_v17, %v4405_v16 }
 0x796   :  { %v2885_v21 = vmul.f32 %v4409_v18, %v5023_v54 }
 0x798   :  { %v5055_v22 = vadd.f32 %v2886_v19, %v2885_v21 }
 0x79a   :  { %4412 = vtanh.f32 %v5055_v22 }
 0x79c   :  { %v4411_v23 = vpop.eup %4410 }
 0x7a4   :  { %v4413_v24 = vpop.eup %4412 }
 0x7a5   :  { %v2889_v25 = vmul.f32 %v4413_v24, %v4411_v23 }
 0x7a7   :  { %4012 = vmatmul.mubr.msk.f32.vlgmr.msra.gmra.mrb[44].mxu0 %vm123_vm0, %v2889_v25  ;;  %4023 = vmatmul.mubr.msk.f32.vlgmr.msra.gmra.mrb[44].mxu1 %vm123_vm0, %v2889_v25 }
 0x7a8   :  { %4272 = vmatpush3.bf16.msra.mxu0 %v4793_v50  ;;  %4278 = vmatpush3.bf16.msra.mxu1 %v4797_v51  ;;  %v3209_v50 = vld [vmem:[#allocation11] sm:$0xff]  ;;  %v3210_v51 = vld [vmem:[#allocation11 + $0x8] sm:$0xff] }
 0x7a9   :  { %4273 = vmatprep.subr.bf16.mxu0 %v4604_v31  ;;  %4279 = vmatprep.subr.bf16.mxu1 %v4604_v31  ;;  %v4283_v27 = vpack.c.bf16 %v3210_v51, %v3209_v50 }
 0x7aa   :  { %4033 = vmatprep.mubr.msk.f32.mxu0 %vm4605_vm1, %v4606_v49  ;;  %4044 = vmatprep.mubr.msk.f32.mxu1 %vm4605_vm1, %v4606_v49 }
 0x7ac   :  { %4275 = vmatpush3.bf16.msra.mxu0 %v4802_v56  ;;  %4281 = vmatpush3.bf16.msra.mxu1 %v4806_v57  ;;  %v2891_v56 = vld [vmem:[#allocation2 + $0x38] sm:$0xff] }
 0x7ad   :  { %4282 = vmatprep.subr.bf16.mxu0 %v4604_v31 }
 0x7af   :  { %4034 = vmatmul.mubr.msk.f32.vlgmr.msra.gmra.mrb[46].mxu0 %vm123_vm0, %v2889_v25  ;;  %4045 = vmatmul.mubr.msk.f32.vlgmr.msra.gmra.mrb[46].mxu1 %vm123_vm0, %v2889_v25 }
 0x7b0   :  { %4055 = vmatprep.mubr.msk.f32.mxu0 %vm4605_vm1, %v4606_v49  ;;  %4284 = vmatpush3.bf16.msra.mxu0 %v4283_v27 }
 0x7b1   :  { %4285 = vmatprep.subr.bf16.mxu0 %v4604_v31  ;;  %v3052_v31 = vld [vmem:[#allocation2 + $0xb8] sm:$0xff] }
 0x7b4   :  { %4287 = vmatpush3.bf16.msra.mxu0 %v4286_v29 }
 0x87a   :  { %v2961_v57 = vpop.f32.mrb[44].mxu0  ;;  %v3040_v32 = vpop.f32.mrb[44].mxu1 }
 0x87b   :  { %v2965_v33 = vadd.f32 %v2961_v57, %v2891_v56  ;;  %v3044_v34 = vadd.f32 %v3040_v32, %v2973_v30  ;;  %v4013_v35 = vpop.f32.mrb[45].mxu0  ;;  %v4024_v36 = vpop.f32.mrb[45].mxu1 }
 0x87d   :  { %v3394_v39 = vmul.f32 -1.442695, %v2965_v33  ;;  %v3396_v49 = vmul.f32 -1.442695, %v3044_v34 }
 0x87f   :  { %4414 = vpow2.f32 %v3394_v39 }
 0x880   :  { %4416 = vpow2.f32 %v3396_v49 }
 0x882   :  { %v3119_v40 = vpop.f32.mrb[46].mxu0  ;;  %v3193_v42 = vpop.f32.mrb[46].mxu1 }
 0x883   :  { %v3197_v45 = vadd.f32 %v3193_v42, %v3126_v41  ;;  %v4035_v46 = vpop.f32.mrb[47].mxu0  ;;  %v4046_v47 = vpop.f32.mrb[47].mxu1  ;;  %v3123_v52 = vadd.f32 %v3119_v40, %v3052_v31 }
 0x885   :  { %v3399_v48 = vmul.f32 -1.442695, %v3197_v45 }
 0x887   :  { %4418 = vpow2.f32 %v3399_v48 }
 0x888   :  { %4420 = vtanh.f32 %v3123_v52 }
 0x889   :  { %v4415_v53 = vpop.eup %4414 }
 0x88a   :  { %v4417_v54 = vpop.eup %4416  ;;  %v2969_v55 = vadd.f32 1.0, %v4415_v53 }
 0x88b   :  { %v3048_v58 = vadd.f32 1.0, %v4417_v54 }
 0x88c   :  { %4422 = vrcp.f32 %v2969_v55 }
 0x88d   :  { %4424 = vrcp.f32 %v3048_v58 }
 0x891   :  { %v4419_v59 = vpop.eup %4418 }
 0x892   :  { %v4421_v37 = vpop.eup %4420  ;;  %v3201_v62 = vadd.f32 1.0, %v4419_v59 }
 0x894   :  { %4426 = vrcp.f32 %v3201_v62 }
 0x896   :  { %v4423_v38 = vpop.eup %4422 }
 0x897   :  { %v4425_v60 = vpop.eup %4424  ;;  %v3205_v61 = vmul.f32 %v4423_v38, %v4421_v37 }
 0x898   :  { %v3204_v63 = vmul.f32 %v4425_v60, %v5055_v22 }
 0x89a   :  { %v3206_v0 = vadd.f32 %v3205_v61, %v3204_v63 }
 0x89c   :  { %4428 = vtanh.f32 %v3206_v0 }
 0x89e   :  { %v4427_v1 = vpop.eup %4426 }
 0x8a6   :  { %v4429_v2 = vpop.eup %4428 }
 0x8a7   :  { %v3208_v3 = vmul.f32 %v4429_v2, %v4427_v1 }
 0x8a9   :  { %4056 = vmatmul.mubr.msk.f32.vlgmr.msra.gmra.mrb[48].mxu0 %vm123_vm0, %v3208_v3 }
 0x97c   :  { %v3289_v43 = vpop.f32.mrb[48].mxu0 }
 0x97d   :  { %v3290_v5 = vadd.f32 %v3400_v4, %v3289_v43  ;;  %v4057_v44 = vpop.f32.mrb[49].mxu0 }
 0x97f   :  { %3293 = vst [vmem:[#allocation14] sm:$0xff] %v3290_v5 }
 0x980   :  { %4573 = shalt.err (!%p4570_p10)
}
 0x981   :  { %s4574_s23 = scalar_lea.hbm %s5096_s6, 128 }
 0x982   :  { %p4575_p11 = scmp.ne.s32.totalorder %s5096_s6, %s4574_s23  ;;  %p4578_p12 = scmp.lt.u32.totalorder %s4574_s23, %s5096_s6 }
 0x984   :  { %p4580_p13 = pnand %p4578_p12, %p4575_p11 }
 0x986   :  { %4583 = shalt.err (!%p4580_p13)
}
 0x987   :  { %3303 = dma.vmem_to_hbm [thread:$0]  %s3301_s10, 128, %s5096_s6, [#allocation5]  }
 0x988   :  { %4592 = dma.done.wait [#allocation5], 128  }
 0x989   :  { %4593 = vsyncadd [#allocation5], 4294967168 }
 0x98a   :  { %3307 = vsyncpa [#allocation4], 1 }
 0x98b   :  { %3308 = vsyncpa [#allocation7], 1 }
 0x98c   :  { %3309 = vsyncpa [#allocation10], 1 }
 0x98d   :  { %3310 = vsyncpa [#allocation13], 1 }
 0x98e   :  { %3311 = vsyncpa [#allocation5], 1 }

</bundles_post_ra>
